<compile_context>
chip_gen: v6e
topology: v6e:2x2x1
jax: 0.10.0
libtpu: 0.0.40
codegen_flags: <defaults>
</compile_context>

<pallas_src>
import functools

import jax
import jax.numpy as jnp
import numpy as np
from jax.experimental import pallas as pl
from jax.experimental.pallas import tpu as pltpu

LN_EPS = 1e-5  # nn.LayerNorm default eps


def _conv_taps(h3, kernel_size):
    """Fused-tap LHS for a 'SAME' Conv1d.

    h3: (TB, Tp, Cin) activations (one T slab per batch element).
    Returns (TB*Tp, K*Cin) bf16: K shifted copies (zero padded at the T
    boundaries of each slab, so no cross-batch leakage) concatenated along the
    lane axis and flattened into a single big-M matmul operand.  The bf16 cast
    happens before the copies so every temporary is half-width.
    """
    TB, Tp, Cin = h3.shape
    K = kernel_size
    pad = (K - 1) // 2
    hb = h3.astype(jnp.bfloat16)
    if pad > 0:
        zpad = jnp.zeros((TB, pad, Cin), jnp.bfloat16)
        hp = jnp.concatenate([zpad, hb, zpad], axis=1)      # (TB, Tp + 2*pad, Cin)
    else:
        hp = hb
    parts = []
    for dk in range(K):
        parts.append(hb if dk == pad else hp[:, dk:dk + Tp, :])
    hcat = jnp.concatenate(parts, axis=-1)                  # (TB, Tp, K*Cin) bf16
    return hcat.reshape(TB * Tp, K * Cin)                   # leading-dim merge (free)


def _conv_block(h3, w_ref, bias, gamma, beta, keep_flat, kernel_size):
    """'SAME' Conv1d(K) + ReLU + channel-LayerNorm + (eval) dropout + mask."""
    TB, Tp, _ = h3.shape
    cout = w_ref.shape[1]
    lhs = _conv_taps(h3, kernel_size)                       # (M, K*Cin) bf16
    acc = jnp.dot(lhs, w_ref[...],
                  preferred_element_type=jnp.float32)       # (M, Cout) f32 acc
    acc = jnp.maximum(acc + bias, 0.0)                      # bias + ReLU (VPU, f32)
    mean = jnp.mean(acc, axis=-1, keepdims=True)            # LayerNorm over channels
    var = jnp.mean(jnp.square(acc - mean), axis=-1, keepdims=True)
    normed = (acc - mean) * jax.lax.rsqrt(var + LN_EPS)
    normed = normed * gamma + beta
    # Dropout: identity in eval mode.
    normed = normed * keep_flat                             # xs * (1 - mask)[:, None, :]
    return normed.reshape(TB, Tp, cout)


def _duration_predictor_kernel(x_ref, len_ref, w1_ref, w2_ref, wl_ref, pp_ref,
                               out_ref, *, kernel_size):
    TB, Tp, _ = x_ref.shape
    M = TB * Tp

    # Rebuild the keep mask in-kernel from per-batch lengths (no (B,T) streams).
    lens = len_ref[...]                                     # (TB, 1, 1) int32
    t_idx = jax.lax.broadcasted_iota(jnp.int32, (TB, Tp, 1), 1)
    keep_flat = (t_idx < lens).astype(jnp.float32).reshape(M, 1)

    pp = pp_ref[...]                                        # (8, n_chans) packed params

    x = x_ref[...]                                          # (TB, Tp, idim) bf16
    h = _conv_block(x, w1_ref, pp[0:1, :], pp[1:2, :], pp[2:3, :],
                    keep_flat, kernel_size)
    h = _conv_block(h, w2_ref, pp[3:4, :], pp[4:5, :], pp[5:6, :],
                    keep_flat, kernel_size)

    # Final Linear(n_chans, 1): contract the lane dim of both operands
    # (q.k^T-style "NT" matmul, MXU-native -- no relayout of the (M, C) tile),
    # so the result is produced lane-dense (1, M) and stored unmasked.
    h2 = h.reshape(M, -1).astype(jnp.bfloat16)
    y = jax.lax.dot_general(wl_ref[...], h2,
                            dimension_numbers=(((1,), (1,)), ((), ())),
                            preferred_element_type=jnp.float32)   # (1, M) f32
    y = y + pp[6:7, 0:1]                                    # + linear bias
    out_ref[0] = y.astype(out_ref.dtype)


def duration_predictor(xs, x_masks, params, *, tile_b=None):
    """xs: (B, T, idim) float32; x_masks: (B, T) (1 = padded frame) or None.
    Returns (B, T) log-domain durations (eval-mode forward)."""
    B, T, idim = xs.shape
    K, _, n_chans = params["w1"].shape

    # ---- tiling -----------------------------------------------------------
    t_pad = max(128, ((T + 127) // 128) * 128)         # lane-align T (zero pad, masked)
    if tile_b is None:
        tile_b = max(1, min(B, 512 // t_pad))          # target M ~512 rows per matmul
        if -(-B // tile_b) == 1 and B > 1:             # keep >=2 grid steps when B allows
            tile_b = -(-B // 2)                        #   (v7x dual-TC)
    n_blk = -(-B // tile_b)
    b_pad = n_blk * tile_b
    m_rows = tile_b * t_pad

    # ---- padded / packed operands -----------------------------------------
    # bf16 at the boundary: x is only ever consumed as a bf16 matmul operand.
    xs_p = jnp.pad(xs.astype(jnp.float32),
                   ((0, b_pad - B), (0, t_pad - T), (0, 0))).astype(jnp.bfloat16)
    if x_masks is None:
        lens = jnp.full((B,), T, jnp.int32)
    else:
        # NOTE: assumes x_masks marks trailing padding (t >= length), the
        # standard FastSpeech2 usage.  The exact final mask is applied below.
        lens = jnp.sum(1.0 - x_masks.astype(jnp.float32), axis=1).astype(jnp.int32)
    lens_p = jnp.pad(lens, (0, b_pad - B)).reshape(b_pad, 1, 1)

    w1r = params["w1"].reshape(K * idim, n_chans).astype(jnp.bfloat16)
    w2r = params["w2"].reshape(K * n_chans, n_chans).astype(jnp.bfloat16)
    wlr = params["wl"].reshape(1, n_chans).astype(jnp.bfloat16)
    # Coalesce the 7 tiny per-channel params into one (8, n_chans) f32 block.
    pp = jnp.concatenate(
        [params["b1"], params["g1"], params["be1"],
         params["b2"], params["g2"], params["be2"],
         jnp.broadcast_to(params["bl"].reshape(1, 1), (1, n_chans)),
         jnp.zeros((1, n_chans), jnp.float32)], axis=0)

    flops = 2 * b_pad * t_pad * (K * idim * n_chans + K * n_chans * n_chans + n_chans)
    bytes_accessed = (xs_p.size * 2 + lens_p.size * 4 + pp.size * 4
                      + (w1r.size + w2r.size + wlr.size) * 2 + b_pad * t_pad * 4)
    cost = pl.CostEstimate(flops=flops, transcendentals=2 * b_pad * t_pad,
                           bytes_accessed=bytes_accessed)

    out = pl.pallas_call(
        functools.partial(_duration_predictor_kernel, kernel_size=K),
        out_shape=jax.ShapeDtypeStruct((n_blk, 1, m_rows), jnp.float32),
        grid=(n_blk,),
        in_specs=[
            pl.BlockSpec((tile_b, t_pad, idim), lambda b: (b, 0, 0)),   # activations
            pl.BlockSpec((tile_b, 1, 1), lambda b: (b, 0, 0)),          # lengths (i32)
            pl.BlockSpec((K * idim, n_chans), lambda b: (0, 0)),        # conv1 W (fused taps)
            pl.BlockSpec((K * n_chans, n_chans), lambda b: (0, 0)),     # conv2 W (fused taps)
            pl.BlockSpec((1, n_chans), lambda b: (0, 0)),               # linear W row
            pl.BlockSpec((8, n_chans), lambda b: (0, 0)),               # packed small params
        ],
        out_specs=pl.BlockSpec((1, 1, m_rows), lambda b: (b, 0, 0)),    # lane-dense store
        compiler_params=pltpu.CompilerParams(
            dimension_semantics=("parallel",),
            vmem_limit_bytes=64 * 1024 * 1024),
        cost_estimate=cost,
    )(xs_p, lens_p, w1r, w2r, wlr, pp)

    out = out.reshape(b_pad, t_pad)[:B, :T]
    if x_masks is not None:                       # exact final mask (module semantics)
        out = out * (1.0 - x_masks.astype(jnp.float32))
    return out


def reference(xs, x_masks, params):
    """Pure-JAX f32 reference mirroring the PyTorch forward."""
    keep = (1.0 - x_masks.astype(jnp.float32))[:, :, None]
    h = xs
    for (W, b, g, be) in [(params["w1"], params["b1"], params["g1"], params["be1"]),
                          (params["w2"], params["b2"], params["g2"], params["be2"])]:
        K = W.shape[0]
        pad = (K - 1) // 2
        T = h.shape[1]
        hp = jnp.pad(h, ((0, 0), (pad, pad), (0, 0)))
        y = sum(jnp.einsum("btc,cd->btd", hp[:, dk:dk + T], W[dk]) for dk in range(K)) + b
        y = jnp.maximum(y, 0.0)
        mean = y.mean(-1, keepdims=True)
        var = ((y - mean) ** 2).mean(-1, keepdims=True)
        y = (y - mean) / jnp.sqrt(var + LN_EPS) * g + be
        h = y * keep
    out = h @ params["wl"] + params["bl"]
    out = out * keep
    return out[..., 0]


def make_params(key, idim, n_chans, kernel_size):
    ks = jax.random.split(key, 6)
    s1 = 1.0 / np.sqrt(idim * kernel_size)
    s2 = 1.0 / np.sqrt(n_chans * kernel_size)
    sl = 1.0 / np.sqrt(n_chans)
    return {
        "w1": jax.random.uniform(ks[0], (kernel_size, idim, n_chans), jnp.float32, -s1, s1),
        "b1": jax.random.uniform(ks[1], (1, n_chans), jnp.float32, -s1, s1),
        "g1": jnp.ones((1, n_chans), jnp.float32),
        "be1": jnp.zeros((1, n_chans), jnp.float32),
        "w2": jax.random.uniform(ks[2], (kernel_size, n_chans, n_chans), jnp.float32, -s2, s2),
        "b2": jax.random.uniform(ks[3], (1, n_chans), jnp.float32, -s2, s2),
        "g2": jnp.ones((1, n_chans), jnp.float32),
        "be2": jnp.zeros((1, n_chans), jnp.float32),
        "wl": jax.random.uniform(ks[4], (n_chans, 1), jnp.float32, -sl, sl),
        "bl": jax.random.uniform(ks[5], (1, 1), jnp.float32, -sl, sl),
    }


if __name__ == "__main__":
    # Lane-friendly small test sizes (channels = 128 so vregs/MXU are not 3/4 idle).
    B, T, idim, n_chans, K = 2, 16, 128, 128, 3

    key = jax.random.PRNGKey(0)
    k_x, k_p = jax.random.split(key)
    xs = jax.random.normal(k_x, (B, T, idim), jnp.float32)
    # mask: 1 where padded (t >= length), 0 where valid
    lengths = jnp.array([16, 11], jnp.int32)
    x_masks = (jnp.arange(T)[None, :] >= lengths[:, None]).astype(jnp.float32)

    params = make_params(k_p, idim, n_chans, K)

    out = duration_predictor(xs, x_masks, params)
    out = jax.block_until_ready(out)

    ref = reference(xs, x_masks, params)
    # bf16 matmul operands (f32 accumulation) => loosened tolerance vs f32 reference.
    np.testing.assert_allclose(np.asarray(out), np.asarray(ref), rtol=5e-2, atol=5e-2)
    assert out.shape == (B, T)

    print("KERNEL_OK")
</pallas_src>

<mosaic_0001>
module attributes {stable_mosaic.version = 11 : i64} {
  func.func @_duration_predictor_kernel(%arg0: i32, %arg1: memref<1x128x128xbf16, #tpu.memory_space<vmem>>, %arg2: memref<1x1x1xi32, #tpu.memory_space<vmem>>, %arg3: memref<384x128xbf16, #tpu.memory_space<vmem>>, %arg4: memref<384x128xbf16, #tpu.memory_space<vmem>>, %arg5: memref<1x128xbf16, #tpu.memory_space<vmem>>, %arg6: memref<8x128xf32, #tpu.memory_space<vmem>>, %arg7: memref<1x1x128xf32, #tpu.memory_space<vmem>>) attributes {dimension_semantics = [#tpu.dimension_semantics<parallel>], iteration_bounds = array<i64: 2>, scalar_prefetch = 0 : i64, scratch_operands = 0 : i64, tpu.core_type = #tpu.core_type<tc>, window_params = [{transform_indices = @transform_0, window_bounds = array<i64: 1, 128, 128>}, {transform_indices = @transform_1, window_bounds = array<i64: 1, 1, 1>}, {pipeline_mode = #tpu.pipeline_mode<synchronous>, transform_indices = @transform_2, window_bounds = array<i64: 384, 128>}, {pipeline_mode = #tpu.pipeline_mode<synchronous>, transform_indices = @transform_3, window_bounds = array<i64: 384, 128>}, {pipeline_mode = #tpu.pipeline_mode<synchronous>, transform_indices = @transform_4, window_bounds = array<i64: 1, 128>}, {pipeline_mode = #tpu.pipeline_mode<synchronous>, transform_indices = @transform_5, window_bounds = array<i64: 8, 128>}, {transform_indices = @transform_6, window_bounds = array<i64: 1, 1, 128>}]} {
    %c0 = arith.constant 0 : index
    %c0_0 = arith.constant 0 : index
    %c0_1 = arith.constant 0 : index
    %0 = vector.load %arg2[%c0, %c0_0, %c0_1] : memref<1x1x1xi32, #tpu.memory_space<vmem>>, vector<1x1x1xi32>
    %1 = tpu.iota {dimensions = array<i32: 1>} : vector<1x128x1xi32>
    %2 = vector.broadcast %0 : vector<1x1x1xi32> to vector<1x128x1xi32>
    %3 = arith.cmpi slt, %1, %2 : vector<1x128x1xi32>
    %4 = arith.extui %3 : vector<1x128x1xi1> to vector<1x128x1xi32>
    %5 = arith.sitofp %4 : vector<1x128x1xi32> to vector<1x128x1xf32>
    %6 = vector.shape_cast %5 : vector<1x128x1xf32> to vector<128x1xf32>
    %c0_2 = arith.constant 0 : index
    %c0_3 = arith.constant 0 : index
    %7 = vector.load %arg6[%c0_2, %c0_3] : memref<8x128xf32, #tpu.memory_space<vmem>>, vector<8x128xf32>
    %c0_4 = arith.constant 0 : index
    %c0_5 = arith.constant 0 : index
    %c0_6 = arith.constant 0 : index
    %8 = vector.load %arg1[%c0_4, %c0_5, %c0_6] : memref<1x128x128xbf16, #tpu.memory_space<vmem>>, vector<1x128x128xbf16>
    %9 = vector.extract_strided_slice %7 {offsets = [0, 0], sizes = [1, 128], strides = [1, 1]} : vector<8x128xf32> to vector<1x128xf32>
    %10 = vector.extract_strided_slice %7 {offsets = [1, 0], sizes = [1, 128], strides = [1, 1]} : vector<8x128xf32> to vector<1x128xf32>
    %11 = vector.extract_strided_slice %7 {offsets = [2, 0], sizes = [1, 128], strides = [1, 1]} : vector<8x128xf32> to vector<1x128xf32>
    %cst = arith.constant 0.000000e+00 : bf16
    %12 = vector.broadcast %cst : bf16 to vector<1x1x128xbf16>
    %13 = tpu.concatenate %12, %8, %12 in 1 : vector<1x1x128xbf16>, vector<1x128x128xbf16>, vector<1x1x128xbf16> -> vector<1x130x128xbf16>
    %14 = vector.extract_strided_slice %13 {offsets = [0, 0, 0], sizes = [1, 128, 128], strides = [1, 1, 1]} : vector<1x130x128xbf16> to vector<1x128x128xbf16>
    %15 = vector.extract_strided_slice %13 {offsets = [0, 2, 0], sizes = [1, 128, 128], strides = [1, 1, 1]} : vector<1x130x128xbf16> to vector<1x128x128xbf16>
    %16 = tpu.concatenate %14, %8, %15 in 2 : vector<1x128x128xbf16>, vector<1x128x128xbf16>, vector<1x128x128xbf16> -> vector<1x128x384xbf16>
    %17 = vector.shape_cast %16 : vector<1x128x384xbf16> to vector<128x384xbf16>
    %c0_7 = arith.constant 0 : index
    %c0_8 = arith.constant 0 : index
    %18 = vector.load %arg3[%c0_7, %c0_8] : memref<384x128xbf16, #tpu.memory_space<vmem>>, vector<384x128xbf16>
    %cst_9 = arith.constant dense<0.000000e+00> : vector<128x128xf32>
    %19 = tpu.matmul %17, %18, %cst_9 {dimension_numbers = #tpu.dot_dimension_numbers<[1], [0], [0], [1], [0, 0, 1, 1], [], []>} : vector<128x384xbf16>, vector<384x128xbf16>, vector<128x128xf32> -> vector<128x128xf32>
    %20 = vector.broadcast %9 : vector<1x128xf32> to vector<128x128xf32>
    %21 = arith.addf %19, %20 : vector<128x128xf32>
    %cst_10 = arith.constant 0.000000e+00 : f32
    %22 = vector.broadcast %cst_10 : f32 to vector<128x128xf32>
    %23 = arith.maximumf %21, %22 : vector<128x128xf32>
    %cst_11 = arith.constant dense<0.000000e+00> : vector<128xf32>
    %24 = vector.multi_reduction <add>, %23, %cst_11 [1] : vector<128x128xf32> to vector<128xf32>
    %25 = vector.shape_cast %24 : vector<128xf32> to vector<128x1xf32>
    %cst_12 = arith.constant 1.280000e+02 : f32
    %26 = vector.broadcast %cst_12 : f32 to vector<128x1xf32>
    %27 = arith.divf %25, %26 : vector<128x1xf32>
    %28 = vector.broadcast %27 : vector<128x1xf32> to vector<128x128xf32>
    %29 = arith.subf %23, %28 : vector<128x128xf32>
    %30 = arith.mulf %29, %29 : vector<128x128xf32>
    %cst_13 = arith.constant dense<0.000000e+00> : vector<128xf32>
    %31 = vector.multi_reduction <add>, %30, %cst_13 [1] : vector<128x128xf32> to vector<128xf32>
    %32 = vector.shape_cast %31 : vector<128xf32> to vector<128x1xf32>
    %cst_14 = arith.constant 1.280000e+02 : f32
    %33 = vector.broadcast %cst_14 : f32 to vector<128x1xf32>
    %34 = arith.divf %32, %33 : vector<128x1xf32>
    %35 = vector.broadcast %27 : vector<128x1xf32> to vector<128x128xf32>
    %36 = arith.subf %23, %35 : vector<128x128xf32>
    %cst_15 = arith.constant 9.99999974E-6 : f32
    %37 = vector.broadcast %cst_15 : f32 to vector<128x1xf32>
    %38 = arith.addf %34, %37 : vector<128x1xf32>
    %39 = math.rsqrt %38 : vector<128x1xf32>
    %40 = vector.broadcast %39 : vector<128x1xf32> to vector<128x128xf32>
    %41 = arith.mulf %36, %40 : vector<128x128xf32>
    %42 = vector.broadcast %10 : vector<1x128xf32> to vector<128x128xf32>
    %43 = arith.mulf %41, %42 : vector<128x128xf32>
    %44 = vector.broadcast %11 : vector<1x128xf32> to vector<128x128xf32>
    %45 = arith.addf %43, %44 : vector<128x128xf32>
    %46 = vector.broadcast %6 : vector<128x1xf32> to vector<128x128xf32>
    %47 = arith.mulf %45, %46 : vector<128x128xf32>
    %48 = vector.shape_cast %47 : vector<128x128xf32> to vector<1x128x128xf32>
    %49 = vector.extract_strided_slice %7 {offsets = [3, 0], sizes = [1, 128], strides = [1, 1]} : vector<8x128xf32> to vector<1x128xf32>
    %50 = vector.extract_strided_slice %7 {offsets = [4, 0], sizes = [1, 128], strides = [1, 1]} : vector<8x128xf32> to vector<1x128xf32>
    %51 = vector.extract_strided_slice %7 {offsets = [5, 0], sizes = [1, 128], strides = [1, 1]} : vector<8x128xf32> to vector<1x128xf32>
    %52 = arith.truncf %48 : vector<1x128x128xf32> to vector<1x128x128xbf16>
    %cst_16 = arith.constant 0.000000e+00 : bf16
    %53 = vector.broadcast %cst_16 : bf16 to vector<1x1x128xbf16>
    %54 = tpu.concatenate %53, %52, %53 in 1 : vector<1x1x128xbf16>, vector<1x128x128xbf16>, vector<1x1x128xbf16> -> vector<1x130x128xbf16>
    %55 = vector.extract_strided_slice %54 {offsets = [0, 0, 0], sizes = [1, 128, 128], strides = [1, 1, 1]} : vector<1x130x128xbf16> to vector<1x128x128xbf16>
    %56 = vector.extract_strided_slice %54 {offsets = [0, 2, 0], sizes = [1, 128, 128], strides = [1, 1, 1]} : vector<1x130x128xbf16> to vector<1x128x128xbf16>
    %57 = tpu.concatenate %55, %52, %56 in 2 : vector<1x128x128xbf16>, vector<1x128x128xbf16>, vector<1x128x128xbf16> -> vector<1x128x384xbf16>
    %58 = vector.shape_cast %57 : vector<1x128x384xbf16> to vector<128x384xbf16>
    %c0_17 = arith.constant 0 : index
    %c0_18 = arith.constant 0 : index
    %59 = vector.load %arg4[%c0_17, %c0_18] : memref<384x128xbf16, #tpu.memory_space<vmem>>, vector<384x128xbf16>
    %cst_19 = arith.constant dense<0.000000e+00> : vector<128x128xf32>
    %60 = tpu.matmul %58, %59, %cst_19 {dimension_numbers = #tpu.dot_dimension_numbers<[1], [0], [0], [1], [0, 0, 1, 1], [], []>} : vector<128x384xbf16>, vector<384x128xbf16>, vector<128x128xf32> -> vector<128x128xf32>
    %61 = vector.broadcast %49 : vector<1x128xf32> to vector<128x128xf32>
    %62 = arith.addf %60, %61 : vector<128x128xf32>
    %cst_20 = arith.constant 0.000000e+00 : f32
    %63 = vector.broadcast %cst_20 : f32 to vector<128x128xf32>
    %64 = arith.maximumf %62, %63 : vector<128x128xf32>
    %cst_21 = arith.constant dense<0.000000e+00> : vector<128xf32>
    %65 = vector.multi_reduction <add>, %64, %cst_21 [1] : vector<128x128xf32> to vector<128xf32>
    %66 = vector.shape_cast %65 : vector<128xf32> to vector<128x1xf32>
    %cst_22 = arith.constant 1.280000e+02 : f32
    %67 = vector.broadcast %cst_22 : f32 to vector<128x1xf32>
    %68 = arith.divf %66, %67 : vector<128x1xf32>
    %69 = vector.broadcast %68 : vector<128x1xf32> to vector<128x128xf32>
    %70 = arith.subf %64, %69 : vector<128x128xf32>
    %71 = arith.mulf %70, %70 : vector<128x128xf32>
    %cst_23 = arith.constant dense<0.000000e+00> : vector<128xf32>
    %72 = vector.multi_reduction <add>, %71, %cst_23 [1] : vector<128x128xf32> to vector<128xf32>
    %73 = vector.shape_cast %72 : vector<128xf32> to vector<128x1xf32>
    %cst_24 = arith.constant 1.280000e+02 : f32
    %74 = vector.broadcast %cst_24 : f32 to vector<128x1xf32>
    %75 = arith.divf %73, %74 : vector<128x1xf32>
    %76 = vector.broadcast %68 : vector<128x1xf32> to vector<128x128xf32>
    %77 = arith.subf %64, %76 : vector<128x128xf32>
    %cst_25 = arith.constant 9.99999974E-6 : f32
    %78 = vector.broadcast %cst_25 : f32 to vector<128x1xf32>
    %79 = arith.addf %75, %78 : vector<128x1xf32>
    %80 = math.rsqrt %79 : vector<128x1xf32>
    %81 = vector.broadcast %80 : vector<128x1xf32> to vector<128x128xf32>
    %82 = arith.mulf %77, %81 : vector<128x128xf32>
    %83 = vector.broadcast %50 : vector<1x128xf32> to vector<128x128xf32>
    %84 = arith.mulf %82, %83 : vector<128x128xf32>
    %85 = vector.broadcast %51 : vector<1x128xf32> to vector<128x128xf32>
    %86 = arith.addf %84, %85 : vector<128x128xf32>
    %87 = vector.broadcast %6 : vector<128x1xf32> to vector<128x128xf32>
    %88 = arith.mulf %86, %87 : vector<128x128xf32>
    %89 = vector.shape_cast %88 : vector<128x128xf32> to vector<1x128x128xf32>
    %90 = vector.shape_cast %89 : vector<1x128x128xf32> to vector<128x128xf32>
    %91 = arith.truncf %90 : vector<128x128xf32> to vector<128x128xbf16>
    %c0_26 = arith.constant 0 : index
    %c0_27 = arith.constant 0 : index
    %92 = vector.load %arg5[%c0_26, %c0_27] : memref<1x128xbf16, #tpu.memory_space<vmem>>, vector<1x128xbf16>
    %cst_28 = arith.constant dense<0.000000e+00> : vector<1x128xf32>
    %93 = tpu.matmul %92, %91, %cst_28 {dimension_numbers = #tpu.dot_dimension_numbers<[1], [1], [0], [0], [0, 0, 1, 0], [], []>} : vector<1x128xbf16>, vector<128x128xbf16>, vector<1x128xf32> -> vector<1x128xf32>
    %94 = vector.extract_strided_slice %7 {offsets = [6, 0], sizes = [1, 1], strides = [1, 1]} : vector<8x128xf32> to vector<1x1xf32>
    %95 = vector.broadcast %94 : vector<1x1xf32> to vector<1x128xf32>
    %96 = arith.addf %93, %95 : vector<1x128xf32>
    %c0_29 = arith.constant 0 : index
    %c0_30 = arith.constant 0 : index
    %c0_31 = arith.constant 0 : index
    %97 = vector.load %arg7[%c0_29, %c0_30, %c0_31] : memref<1x1x128xf32, #tpu.memory_space<vmem>>, vector<1x1x128xf32>
    %98 = vector.shape_cast %97 : vector<1x1x128xf32> to vector<1x128xf32>
    %99 = vector.shape_cast %96 : vector<1x128xf32> to vector<1x1x128xf32>
    tpu.vector_store %arg7[%c0_29, %c0_30, %c0_31], %99 {strides = array<i32>} : memref<1x1x128xf32, #tpu.memory_space<vmem>>, vector<1x1x128xf32>,
    return
  }
  func.func @transform_0(%arg0: i32) -> (i32, i32, i32) {
    %c0_i32 = arith.constant 0 : i32
    %c0_i32_0 = arith.constant 0 : i32
    %c0_i32_1 = arith.constant 0 : i32
    return %arg0, %c0_i32, %c0_i32_0 : i32, i32, i32
  }
  func.func @transform_1(%arg0: i32) -> (i32, i32, i32) {
    %c0_i32 = arith.constant 0 : i32
    %c0_i32_0 = arith.constant 0 : i32
    %c0_i32_1 = arith.constant 0 : i32
    return %arg0, %c0_i32, %c0_i32_0 : i32, i32, i32
  }
  func.func @transform_2(%arg0: i32) -> (i32, i32) {
    %c0_i32 = arith.constant 0 : i32
    %c0_i32_0 = arith.constant 0 : i32
    %c0_i32_1 = arith.constant 0 : i32
    return %c0_i32, %c0_i32_0 : i32, i32
  }
  func.func @transform_3(%arg0: i32) -> (i32, i32) {
    %c0_i32 = arith.constant 0 : i32
    %c0_i32_0 = arith.constant 0 : i32
    %c0_i32_1 = arith.constant 0 : i32
    return %c0_i32, %c0_i32_0 : i32, i32
  }
  func.func @transform_4(%arg0: i32) -> (i32, i32) {
    %c0_i32 = arith.constant 0 : i32
    %c0_i32_0 = arith.constant 0 : i32
    %c0_i32_1 = arith.constant 0 : i32
    return %c0_i32, %c0_i32_0 : i32, i32
  }
  func.func @transform_5(%arg0: i32) -> (i32, i32) {
    %c0_i32 = arith.constant 0 : i32
    %c0_i32_0 = arith.constant 0 : i32
    %c0_i32_1 = arith.constant 0 : i32
    return %c0_i32, %c0_i32_0 : i32, i32
  }
  func.func @transform_6(%arg0: i32) -> (i32, i32, i32) {
    %c0_i32 = arith.constant 0 : i32
    %c0_i32_0 = arith.constant 0 : i32
    %c0_i32_1 = arith.constant 0 : i32
    return %arg0, %c0_i32, %c0_i32_0 : i32, i32, i32
  }
}

</mosaic_0001>

<bundles_post_ra>
// kernel: tpu_custom_call.1
= control target key start
LH: loop header
LB: loop body
LE: loop exit
PB: predicated region body
PF: predicated region fallthrough
CT: control target
= control target key end

     0   :  { %11 = vsyncpa [#allocation3], 0  ;;  %s3972_s0 = inlined_call_operand.hbm [shape: bf16[2,128,128], index: 0, kind: input, shape index: {}]   ;;  %s3973_s1 = inlined_call_operand.vmem [shape: s32[2,1,1], index: 1, kind: input, shape index: {}]   ;;  %s3974_s2 = inlined_call_operand.hbm [shape: bf16[384,128], index: 2, kind: input, shape index: {}]   ;;  %s3975_s3 = inlined_call_operand.hbm [shape: bf16[384,128], index: 3, kind: input, shape index: {}]   ;;  %s3976_s4 = inlined_call_operand.vmem [shape: bf16[1,128], index: 4, kind: input, shape index: {}]   ;;  %s3977_s5 = inlined_call_operand.vmem [shape: f32[8,128], index: 5, kind: input, shape index: {}]   ;;  %s3978_s6 = inlined_call_operand.hbm [shape: f32[2,1,128], index: 6, kind: output, shape index: {}]  }
   0x1   :  { %13 = vsyncpa [#allocation3 + $0x1], 0 }
   0x2   :  { %14 = vsyncpa [#allocation6], 0 }
   0x3   :  { %15 = vsyncpa [#allocation4], 0 }
   0x4   :  { %17 = vsyncpa [#allocation4 + $0x1], 0  ;;  %s2953_s21 = smov 0   ;;  %s2955_s22 = smov 0  }
   0x5   :  { %s2957_s23 = smov 0   ;;  %s2959_s24 = smov 0  }
   0x6 LB: > { %s2974_s25 = sadd.s32 4294967295, %s2907_s24   ;;  %s2182_s26 = sadd.s32 4294967294, %s2907_s24   ;;  %s2907_s24 = sphi %s2959_s24, %s4040_s24   ;;  %s2903_s23 = sphi %s2957_s23, %s4039_s23   ;;  %s2899_s22 = sphi %s2955_s22, %s4038_s22   ;;  %s2895_s21 = sphi %s2953_s21, %s4037_s21  }
   0x7   : > { %p43_p0 = scmp.ne.s32.totalorder %s2899_s22, %s2895_s21  ;;  %p3979_p1 = scmp.eq.s32.totalorder %s2974_s25, 0 }
   0x8   : > { %p177_p2 = scmp.eq.s32.totalorder %s2974_s25, 1  ;;  %p183_p3 = scmp.eq.s32.totalorder %s2182_s26, 1 }
   0x9   : > { %p2983_p4 = por %p3979_p1, %p43_p0  ;;  %p2183_p5 = scmp.ge.s32.totalorder %s2907_s24, 1 }
   0xa   : > { %p2988_p6 = por %p183_p3, %p43_p0  ;;  %p190_p7 = scmp.lt.s32.totalorder %s2907_s24, 3 }
   0xb   : > { %s4003_s27 = scalar_select %p2983_p4, 1, 0 }
   0xc   : > { %s4004_s28 = scalar_select %p2988_p6, 1, 0 }
   0xd   : > { %p2993_p8 = pnand %p2183_p5, %p190_p7  ;;  %s2909_s30 = smov [#allocation5]  }
   0xe   : > { %s202_s7 = sshll.u32 %s2909_s30, 4  ;;  %s2910_s9 = smov [#allocation7]   ;;  %s203_s7 = int_to_ptr.vmem [resolvable:$true] %s202_s7 }
   0xf   : > { %s4005_s29 = scalar_select %p2993_p8, 1, 0 }
  0x10   : > { %p2536_p9 = pneg %p2993_p8  ;;  %s215_s10 = sshll.u32 %s2910_s9, 4  ;;  %s216_s10 = int_to_ptr.vmem [resolvable:$true] %s215_s10 }
  0x11   : > { %s2770_s11 = scalar_lea.vmem %s203_s7, 3072  ;;  %p2778_p5 = scmp.lt.s32.totalorder %s203_s7, %s203_s7 }
  0x12   : > { %p3002_p11 = pnand %p2536_p9, %p3979_p1  ;;  %p2771_p13 = scmp.ne.s32.totalorder %s203_s7, %s2770_s11 }
  0x13   : > { %p2779_p7 = scmp.lt.s32.totalorder %s2770_s11, %s2770_s11 }
  0x14   : > { %p2761_p12 = pneg %p3002_p11 }
  0x15   : > { %p2780_p10 = por %p2779_p7, %p2778_p5 }
  0x16   : > { %p2773_p0 = pnand %p2771_p13, %p2761_p12 }
  0x18   : > { %p2774_p3 = pneg %p2773_p0 }
  0x1a   : > { %p2781_p9 = pnand %p2780_p10, %p2774_p3 }
  0x1c   : > { %2784 = shalt.err (!%p2781_p9)
}
  0x1d   : > { %s3980_s12 = smov 64   ;;  %s3981_s13 = smov 4  }
  0x1e   : > { %2539 = dma.hbm_to_vmem [thread:$0]  (!%p3002_p11), %s3974_s2, 3072, %s203_s7, [#allocation6], %s3980_s12, %s3980_s12, %s3981_s13  }
  0x1f   : > { %s2796_s16 = scalar_lea.vmem %s216_s10, 3072  ;;  %p2804_p10 = scmp.lt.s32.totalorder %s216_s10, %s216_s10 }
  0x20   : > { %p2797_p13 = scmp.ne.s32.totalorder %s216_s10, %s2796_s16  ;;  %p2805_p3 = scmp.lt.s32.totalorder %s2796_s16, %s2796_s16 }
  0x22   : > { %p2799_p0 = pnand %p2797_p13, %p2761_p12  ;;  %p2806_p7 = por %p2805_p3, %p2804_p10 }
  0x24   : > { %p2800_p5 = pneg %p2799_p0 }
  0x26   : > { %p2807_p9 = pnand %p2806_p7, %p2800_p5 }
  0x28   : > { %2810 = shalt.err (!%p2807_p9)
}
  0x29   : > { %2542 = dma.hbm_to_vmem [thread:$0]  (!%p3002_p11), %s3975_s3, 3072, %s216_s10, [#allocation6], %s3980_s12, %s3980_s12, %s3981_s13  }
  0x2a   : > { %s3031_s19 = sadd.s32 1, %s2907_s24   ;;  %s30_s20 = sadd.s32 1, %s2903_s23 }
  0x2b   : > { %s27_s26 = ssub.s32 %s2907_s24, %s3031_s19  ;;  %p37_p12 = scmp.ne.s32.totalorder %s2903_s23, %s2899_s22 }
  0x2c   : > { %p28_p13 = scmp.eq.s32.totalorder %s27_s26, 0  ;;  %p38_p0 = scmp.eq.s32.totalorder %s2907_s24, 0 }
  0x2d   : > { %p3041_p5 = por %p177_p2, %p37_p12  ;;  %p2553_p10 = scmp.lt.s32.totalorder %s2907_s24, 2 }
  0x2e   : > { %s3047_s7 = scalar_select %p28_p13, %s2903_s23, %s30_s20  }
  0x2f   : > { %s4007_s30 = scalar_select %p3041_p5, 1, 0 }
  0x30   : > { %p39_p3 = por %p38_p0, %p37_p12  ;;  %s235_s8 = sand.u32 1, %s2903_s23  }
  0x31   : > { %s2187_s9 = sshll.u32 %s235_s8, 6  ;;  %s2270_s10 = sshll.u32 %s2907_s24, 10 }
  0x32   : > { %s3054_s15 = scalar_lea.hbm %s3972_s0, %s2270_s10  ;;  %s239_s16 = scalar_lea.vmem [#allocation2], %s2187_s9 }
  0x33   : > { %s246_s17 = sshll.u32 %s239_s16, 4  ;;  %p3058_p2 = pnand %p2553_p10, %p39_p3  ;;  %s3056_s17 = int_to_ptr.vmem [resolvable:$true] %s246_s17 }
  0x34   : > { %s3062_s20 = scalar_lea.sflag [#allocation3], %s235_s8  ;;  %s2811_s26 = scalar_lea.hbm %s3054_s15, 1024 }
  0x35   : > { %p2812_p11 = scmp.ne.s32.totalorder %s3054_s15, %s2811_s26  ;;  %p2813_p7 = pneg %p3058_p2 }
  0x36   : > { %s2816_s9 = scalar_lea.hbm %s3972_s0, 2048  ;;  %p2817_p13 = scmp.lt.s32.totalorder %s3054_s15, %s3972_s0 }
  0x37   : > { %p2814_p9 = pnand %p2813_p7, %p2812_p11  ;;  %p2818_p0 = scmp.lt.s32.totalorder %s2816_s9, %s2811_s26 }
  0x39   : > { %p2815_p12 = pneg %p2814_p9  ;;  %p2819_p10 = por %p2818_p0, %p2817_p13 }
  0x3b   : > { %p2820_p3 = pnand %p2819_p10, %p2815_p12 }
  0x3d   : > { %2823 = shalt.err (!%p2820_p3)
}
  0x3e   : > { %s2824_s8 = scalar_lea.vmem %s3056_s17, 1024  ;;  %s2913_s12 = smov [#allocation2]  }
  0x3f   : > { %p2825_p1 = scmp.ne.s32.totalorder %s3056_s17, %s2824_s8  ;;  %s2829_s13 = sshll.u32 %s2913_s12, 4  ;;  %s2830_s13 = int_to_ptr.vmem [resolvable:$false] %s2829_s13 }
  0x40   : > { %s2831_s10 = scalar_lea.vmem %s2830_s13, 2048  ;;  %p2832_p9 = scmp.lt.s32.totalorder %s3056_s17, %s2830_s13 }
  0x41   : > { %p2827_p6 = pnand %p2825_p1, %p2813_p7  ;;  %p2833_p5 = scmp.lt.s32.totalorder %s2831_s10, %s2824_s8 }
  0x43   : > { %p2828_p11 = pneg %p2827_p6  ;;  %p2834_p4 = por %p2833_p5, %p2832_p9 }
  0x45   : > { %p2835_p8 = pnand %p2834_p4, %p2828_p11 }
  0x47   : > { %2838 = shalt.err (!%p2835_p8)
}
  0x48   : > { %s4009_s26 = smov 4   ;;  %s4010_s11 = smov 64  }
  0x49   : > { %2546 = dma.hbm_to_vmem [thread:$0]  (!%p3058_p2), %s3054_s15, 1024, %s3056_s17, %s3062_s20, %s4010_s11, %s4010_s11, %s4009_s26  }
  0x4a   : > { %p4011_p1 = scmp.ne.s32.totalorder %s4005_s29, 0 }
  0x4b   : > { %s3089_s12 = sand.u32 (!%p4011_p1), 1, %s2899_s22   ;;  %p4012_p4 = scmp.ne.s32.totalorder (!%p4011_p1), %s4003_s27, 0 }
  0x4c   : > { %264 = sbr.rel (%p4011_p1) target bundleno = 1618 (0x652), region = 44  ;;  %s2191_s13 = sshll.u32 (!%p4011_p1), %s3089_s12, 6 }
  0x4d   : > { %s267_s9 = scalar_lea.sflag (!%p4011_p1), [#allocation3], %s3089_s12  ;;  %s3093_s14 = scalar_lea.vmem (!%p4011_p1), [#allocation2], %s2191_s13 }
  0x51   : > { %2882 = dma.done.wait (%p4012_p4), %s267_s9, 1024  }
  0x52   : > { %2884 = vsyncadd (%p4012_p4), %s267_s9, 4294966272  ;;  %p4013_p6 = scmp.eq.s32.totalorder %s2974_s25, 0 }
  0x54   : > { %2886 = dma.done.wait (%p4013_p6), [#allocation6], 6144   ;;  %p4014_p8 = pmov %p4013_p6 }
  0x55   : > { %v2638_v0 = vld [vmem:[#allocation5 + $0x78] sm:$0xff]   ;;  %v2640_v2 = vld [vmem:[#allocation5 + $0x70] sm:$0xff]   ;;  %v2643_v5 = vld [vmem:[#allocation5 + $0x68] sm:$0xff]   ;;  %vm440_vm0 = vsmask.f32 256  ;;  %vm513_vm1 = vcmask 1040384  }
  0x56   : > { %2888 = vsyncadd (%p4014_p8), [#allocation6], 4294961152  ;;  %v2639_v1 = vld [vmem:[#allocation5 + $0x38] sm:$0xff]   ;;  %2271 = vmatprep.subr.bf16.mxu0 %v2638_v0  ;;  %v2642_v4 = vld [vmem:[#allocation5 + $0x30] sm:$0xff]   ;;  %vm527_vm3 = vcmask 1046528   ;;  %p309_p5 = scmp.lt.s32.totalorder %s2974_s25, 1 }
  0x57   : > { %2272 = vmatpush3.bf16.msra.mxu0 %v2639_v1  ;;  %v2641_v3 = vld [vmem:[#allocation5 + $0xb8] sm:$0xff]   ;;  %v2644_v6 = vld [vmem:[#allocation5 + $0xb0] sm:$0xff]   ;;  %v2645_v7 = vld [vmem:[#allocation5 + $0x28] sm:$0xff]   ;;  %s2267_s11 = sshll.u32 %s2974_s25, 4  ;;  %s308_s13 = scalar_lea.vmem [#allocation8], %s3089_s12 }
  0x58   : > { %2273 = vmatprep.subr.bf16.mxu0 %v2640_v2  ;;  %2440 = vmatprep.subr.bf16.mxu1 %v2641_v3  ;;  %v2646_v8 = vld [vmem:[#allocation5 + $0x60] sm:$0xff]   ;;  %v2647_v9 = vld [vmem:[#allocation5 + $0xa8] sm:$0xff]   ;;  %v2649_v11 = vld [vmem:[#allocation5 + $0x58] sm:$0xff]   ;;  %s310_s15 = scalar_select %p309_p5, %s2974_s25, 1 }
  0x59   : > { %2441 = vmatpush3.bf16.msra.mxu1 %v2641_v3  ;;  %v2648_v10 = vld [vmem:[#allocation5 + $0x20] sm:$0xff]   ;;  %v2651_v13 = vld [vmem:[#allocation5 + $0x18] sm:$0xff]   ;;  %v2652_v15 = vld [vmem:[#allocation5 + $0x50] sm:$0xff]   ;;  %s2088_s9 = sshll.u32 %s308_s13, 4  ;;  %s3929_s29 = scalar_lea.hbm %s3978_s6, %s2267_s11  ;;  %s3931_s9 = int_to_ptr.vmem [resolvable:$true] %s2088_s9 }
  0x5a   : > { %2442 = vmatprep.subr.bf16.mxu1 %v2644_v6  ;;  %v2650_v12 = vld [vmem:[#allocation5 + $0xa0] sm:$0xff]   ;;  %v2653_v14 = vld [vmem:[#allocation5 + $0x98] sm:$0xff]   ;;  %v2654_v16 = vld [vmem:[#allocation5 + $0x10] sm:$0xff]   ;;  %s311_s20 = scalar_lea.vmem %s3973_s1, %s310_s15  ;;  %s2076_s15 = scalar_lea.sflag [#allocation4], %s3089_s12 }
  0x5b   : > { %2274 = vmatpush3.bf16.msra.mxu0 %v2642_v4  ;;  %v2656_v17 = vld [vmem:[#allocation5 + $0x90] sm:$0xff]   ;;  %v2655_v18 = vld [vmem:[#allocation5 + $0x48] sm:$0xff]   ;;  %v2661_v21 = vld [vmem:[%s3093_s14] sm:$0xff]   ;;  %s2839_s25 = scalar_lea.vmem %s3931_s9, 16  ;;  %p4034_p7 = scmp.ne.s32.totalorder %s4007_s30, 0 }
  0x5c   : > { %2275 = vmatprep.subr.bf16.mxu0 %v2643_v5  ;;  %v2657_v19 = vld [vmem:[#allocation5 + $0x8] sm:$0xff]   ;;  %v2658_v22 = vld [vmem:[#allocation5 + $0x40] sm:$0xff]   ;;  %781 = vmatprep.mubr.bf16.mxu0 %v2661_v21  ;;  %v442_v24 = vshrl.u32 %v2661_v21, 16  ;;  %v445_v25 = vshll.u32 %v2661_v21, 16  ;;  %vm3105_vm2 = vmand %vm513_vm1, %vm440_vm0  ;;  %p2840_p2 = scmp.ne.s32.totalorder %s3931_s9, %s2839_s25  ;;  %s2917_s17 = smov [#allocation8]  }
  0x5d   : > { %2443 = vmatpush3.bf16.msra.mxu1 %v2644_v6  ;;  %v2659_v20 = vld [vmem:[#allocation5 + $0x88] sm:$0xff]   ;;  %v2660_v23 = vld [vmem:[#allocation5] sm:$0xff]   ;;  %v2664_v30 = vld [vmem:[%s3093_s14 + $0x10] sm:$0xff]   ;;  %s2843_s18 = sshll.u32 %s2917_s17, 4  ;;  %s2844_s18 = int_to_ptr.vmem [resolvable:$false] %s2843_s18 }
  0x5e   : > { %2444 = vmatprep.subr.bf16.mxu1 %v2647_v9  ;;  %v2662_v27 = vld [vmem:[#allocation5 + $0x80] sm:$0xff]   ;;  %v2663_v28 = vld [vmem:[%s3093_s14 + $0x8] sm:$0xff]   ;;  %v444_v29 = vrot.slane %v442_v24, 7  ;;  %v3112_v33 = vld [vmem:[%s3093_s14 + $0x18] sm:$0xff]   ;;  %v457_v36 = vshrl.u32 %v2664_v30, 16  ;;  %v460_v37 = vshll.u32 %v2664_v30, 16  ;;  %p2841_p12 = pnand %p2840_p2, %p4034_p7  ;;  %p2846_p0 = scmp.lt.s32.totalorder %s3931_s9, %s2844_s18 }
  0x5f   : > { %2276 = vmatpush3.bf16.msra.mxu0 %v2645_v7  ;;  %v449_v31 = vshrl.u32 %v2663_v28, 16  ;;  %v452_v32 = vshll.u32 %v2663_v28, 16  ;;  %v3115_v34 = vld [vmem:[%s3093_s14 + $0x20] sm:$0xff]   ;;  %v465_v39 = vshrl.u32 %v3112_v33, 16  ;;  %v468_v40 = vshll.u32 %v3112_v33, 16  ;;  %v3124_v45 = vld [vmem:[%s3093_s14 + $0x28] sm:$0xff]  }
  0x60   : > { %2277 = vmatprep.subr.bf16.mxu0 %v2646_v8  ;;  %v447_v35 = vor.u32 %v445_v25, %v444_v29  ;;  %v473_v41 = vshrl.u32 %v3115_v34, 16  ;;  %v459_v43 = vrot.slane %v457_v36, 7  ;;  %v476_v44 = vshll.u32 %v3115_v34, 16  ;;  %v2668_v50 = vld [vmem:[%s3093_s14 + $0x30] sm:$0xff]   ;;  %v2669_v58 = vld [vmem:[%s3093_s14 + $0x38] sm:$0xff]   ;;  %p2842_p13 = pneg %p2841_p12 }
  0x61   : > { %2445 = vmatpush3.bf16.msra.mxu1 %v2647_v9  ;;  %v451_v38 = vrot.slane %v449_v31, 7  ;;  %v467_v48 = vrot.slane %v465_v39, 7  ;;  %v481_v52 = vshrl.u32 %v3124_v45, 16  ;;  %v484_v53 = vshll.u32 %v3124_v45, 16 }
  0x62   : > { %2446 = vmatprep.subr.bf16.mxu1 %v2650_v12  ;;  %v515_v42 = vsel %vm3105_vm2, 0, %v447_v35  ;;  %v475_v49 = vrot.slane %v473_v41, 7  ;;  %v462_v51 = vor.u32 %v460_v37, %v459_v43  ;;  %v489_v57 = vshrl.u32 %v2668_v50, 16 }
  0x63   : > { %2278 = vmatpush3.bf16.msra.mxu0 %v2648_v10  ;;  %v528_v46 = vrot.slane %v515_v42, 1  ;;  %v454_v47 = vor.u32 %v452_v32, %v451_v38  ;;  %v470_v55 = vor.u32 %v468_v40, %v467_v48  ;;  %v483_v61 = vrot.slane %v481_v52, 7  ;;  %v3156_v32 = vld [vmem:[%s3977_s5] sm:$0xff] }
  0x64   : > { %2279 = vmatprep.subr.bf16.mxu0 %v2649_v11  ;;  %v478_v56 = vor.u32 %v476_v44, %v475_v49  ;;  %v463_v60 = vsel %vm440_vm0, %v451_v38, %v462_v51  ;;  %v492_v62 = vshll.u32 %v2668_v50, 16  ;;  %v491_v1 = vrot.slane %v489_v57, 7 }
  0x65   : > { %2447 = vmatpush3.bf16.msra.mxu1 %v2650_v12  ;;  %v455_v54 = vsel %vm440_vm0, %v444_v29, %v454_v47  ;;  %v531_v63 = vrot.slane %v463_v60, 1  ;;  %v471_v0 = vsel %vm440_vm0, %v459_v43, %v470_v55  ;;  %v486_v5 = vor.u32 %v484_v53, %v483_v61 }
  0x66   : > { %2448 = vmatprep.subr.bf16.mxu1 %v2653_v14  ;;  %v529_v59 = vrot.slane %v455_v54, 1  ;;  %v533_v3 = vrot.slane %v471_v0, 1  ;;  %v479_v4 = vsel %vm440_vm0, %v467_v48, %v478_v56  ;;  %v494_v7 = vor.u32 %v492_v62, %v491_v1 }
  0x67   : > { %2280 = vmatpush3.bf16.msra.mxu0 %v2651_v13  ;;  %v497_v8 = vshrl.u32 %v2669_v58, 16  ;;  %v500_v9 = vshll.u32 %v2669_v58, 16  ;;  %v535_v11 = vrot.slane %v479_v4, 1  ;;  %v487_v12 = vsel %vm440_vm0, %v475_v49, %v486_v5 }
  0x68   : > { %2281 = vmatprep.subr.bf16.mxu0 %v2652_v15  ;;  %v530_v2 = vsel %vm527_vm3, %v528_v46, %v529_v59  ;;  %v532_v6 = vsel %vm527_vm3, %v529_v59, %v531_v63  ;;  %v534_v10 = vsel %vm527_vm3, %v531_v63, %v533_v3  ;;  %v495_v15 = vsel %vm440_vm0, %v483_v61, %v494_v7 }
  0x69   : > { %2449 = vmatpush3.bf16.msra.mxu1 %v2653_v14  ;;  %2456 = vmatprep.mubr.bf16.mxu1 %v530_v2  ;;  %v499_v13 = vrot.slane %v497_v8, 7  ;;  %v537_v14 = vrot.slane %v487_v12, 1  ;;  %v314_v29 = vlaneseq }
  0x6a   : > { %2450 = vmatprep.subr.bf16.mxu1 %v2656_v17 }
  0x6b   : > { %2282 = vmatpush3.bf16.msra.mxu0 %v2654_v16  ;;  %v502_v16 = vor.u32 %v500_v9, %v499_v13  ;;  %v516_v24 = vsel %vm3105_vm2, %v499_v13, 0 }
  0x6c   : > { %2283 = vmatprep.subr.bf16.mxu0 %v2655_v18  ;;  %v543_v25 = vrot.slane %v516_v24, 1 }
  0x6d   : > { %2451 = vmatpush3.bf16.msra.mxu1 %v2656_v17  ;;  %v536_v17 = vsel %vm527_vm3, %v533_v3, %v535_v11  ;;  %v503_v18 = vsel %vm440_vm0, %v491_v1, %v502_v16 }
  0x6e   : > { %2452 = vmatprep.subr.bf16.mxu1 %v2659_v20  ;;  %v541_v21 = vrot.slane %v503_v18, 1 }
  0x6f   : > { %2284 = vmatpush3.bf16.msra.mxu0 %v2657_v19  ;;  %v538_v19 = vsel %vm527_vm3, %v535_v11, %v537_v14 }
  0x70   : > { %2285 = vmatprep.subr.bf16.mxu0 %v2658_v22 }
  0x71   : > { %2453 = vmatpush3.bf16.msra.mxu1 %v2659_v20  ;;  %v539_v20 = vrot.slane %v495_v15, 1 }
  0x72   : > { %2454 = vmatprep.subr.bf16.mxu1 %v2662_v27 }
  0x73   : > { %2286 = vmatpush3.bf16.msra.mxu0 %v2660_v23  ;;  %v540_v22 = vsel %vm527_vm3, %v537_v14, %v539_v20  ;;  %v542_v23 = vsel %vm527_vm3, %v539_v20, %v541_v21 }
  0x75   : > { %2455 = vmatpush3.bf16.msra.mxu1 %v2662_v27  ;;  %v544_v27 = vsel %vm527_vm3, %v541_v21, %v543_v25 }
  0x76   : > { %782 = vmatmul.mubr.bf16.vlgmr.msra.gmra.mxu0 %v515_v42 }
  0x77   : > { %789 = vmatprep.mubr.bf16.mxu0 %v2663_v28  ;;  %v2914_v28 = vmov 0  }
  0x78   : > { %2457 = vmatmul.mubr.bf16.vlgmr.msra.gmra.mxu1 %v532_v6  ;;  %2602 = vset.pattern.permute.xlu1 %v2914_v28 }
  0x79   : > { %2460 = vmatprep.mubr.bf16.mxu1 %v534_v10  ;;  %2596 = vset.pattern.permute.xlu0 %v2914_v28 }
  0x7e   : > { %790 = vmatmul.mubr.bf16.gmra.mxu0 %v455_v54 }
  0x7f   : > { %797 = vmatprep.mubr.bf16.mxu0 %v2664_v30  ;;  %v3150_v30 = vshrl.u32 %v314_v29, 7 }
  0x80   : > { %2461 = vmatmul.mubr.bf16.gmra.mxu1 %v536_v17 }
  0x81   : > { %2464 = vmatprep.mubr.bf16.mxu1 %v538_v19  ;;  %v603_v31 = vsub.s32 0, %v3150_v30  ;;  %v317_v9 = vadd.s32 16, %v3150_v30  ;;  %v318_v10 = vadd.s32 24, %v3150_v30  ;;  %v319_v14 = vadd.s32 32, %v3150_v30 }
  0x86   : > { %798 = vmatmul.mubr.bf16.gmra.mxu0 %v463_v60 }
  0x87   : > { %805 = vmatprep.mubr.bf16.mxu0 %v3112_v33 }
  0x88   : > { %2465 = vmatmul.mubr.bf16.gmra.mxu1 %v540_v22  ;;  %v316_v22 = vadd.s32 8, %v3150_v30 }
  0x89   : > { %2468 = vmatprep.mubr.bf16.mxu1 %v542_v23 }
  0x8e   : > { %806 = vmatmul.mubr.bf16.gmra.mxu0 %v471_v0 }
  0x8f   : > { %813 = vmatprep.mubr.bf16.mxu0 %v3115_v34  ;;  %v3159_v34 = vrot.slane %v3156_v32, %v603_v31 }
  0x90   : > { %2469 = vmatmul.mubr.bf16.gmra.mxu1 %v544_v27 }
  0x96   : > { %814 = vmatmul.mubr.bf16.gmra.mxu0 %v479_v4 }
  0x97   : > { %821 = vmatprep.mubr.bf16.mxu0 %v3124_v45 }
  0x9e   : > { %822 = vmatmul.mubr.bf16.gmra.mxu0 %v487_v12  ;;  %v3200_v12 = vld [vmem:[%s311_s20] ss:$0 sm:$0xff]  ;;  %s2845_s20 = scalar_lea.vmem %s2844_s18, 32 }
  0x9f   : > { %829 = vmatprep.mubr.bf16.mxu0 %v2668_v50  ;;  %vm337_vm4 = vcmp.lt.s32.totalorder %v317_v9, %v3200_v12  ;;  %vm338_vm5 = vcmp.lt.s32.totalorder %v318_v10, %v3200_v12  ;;  %vm339_vm6 = vcmp.lt.s32.totalorder %v319_v14, %v3200_v12  ;;  %vm335_vm8 = vcmp.lt.s32.totalorder %v3150_v30, %v3200_v12  ;;  %p2847_p10 = scmp.lt.s32.totalorder %s2845_s20, %s2839_s25 }
  0xa0   : > { %vm336_vm9 = vcmp.lt.s32.totalorder %v316_v22, %v3200_v12 }
  0xa1   : > { %p2848_p3 = por %p2847_p10, %p2846_p0 }
  0xa3   : > { %p2849_p11 = pnand %p2848_p3, %p2842_p13 }
  0xa6   : > { %830 = vmatmul.mubr.bf16.gmra.mxu0 %v495_v15  ;;  %v320_v15 = vadd.s32 40, %v3150_v30 }
  0xa7   : > { %837 = vmatprep.mubr.bf16.mxu0 %v2669_v58 }
  0xa8   : > { %vm340_vm7 = vcmp.lt.s32.totalorder %v320_v15, %v3200_v12 }
  0xae   : > { %838 = vmatmul.mubr.bf16.gmra.mxu0 %v503_v18  ;;  %v4001_v18 = vmov 0.0  }
  0xaf   : > { %v2197_v19 = vsel %vm337_vm4, 1.0, %v4001_v18  ;;  %v2198_v20 = vsel %vm338_vm5, 1.0, %v4001_v18  ;;  %v2199_v25 = vsel %vm339_vm6, 1.0, %v4001_v18  ;;  %v2200_v27 = vsel %vm340_vm7, 1.0, %v4001_v18 }
  0xb0   : > { %v2603_v23 = vpack.i.bf16 %v2198_v20, %v2197_v19  ;;  %v2608_v29 = vpack.i.bf16 %v2200_v27, %v2199_v25 }
 0x136   : > { %v2287_v33 = vpop.f32.mrf.mxu0 }
 0x138   : > { %v2288_v35 = vpop.f32.mrf.mxu0  ;;  %v2458_v38 = vpop.f32.mrf.mxu1 }
 0x139   : > { %v2289_v36 = vadd.f32 %v2288_v35, %v2287_v33  ;;  %v2195_v33 = vsel %vm335_vm8, 1.0, %v4001_v18  ;;  %v2196_v35 = vsel %vm336_vm9, 1.0, %v4001_v18 }
 0x13a   : > { %v2290_v37 = vpop.f32.mrf.mxu0  ;;  %v880_v42 = vpop.f32.mrf.mxu1 }
 0x13b   : > { %v784_v39 = vadd.f32 %v2289_v36, %v3159_v34 }
 0x13c   : > { %v2291_v40 = vpop.f32.mrf.mxu0  ;;  %v2459_v45 = vpop.f32.mrf.mxu1 }
 0x13d   : > { %v2292_v41 = vadd.f32 %v2291_v40, %v2290_v37  ;;  %v3162_v43 = vadd.f32 %v880_v42, %v784_v39  ;;  %v2597_v37 = vpack.i.bf16 %v2196_v35, %v2195_v33 }
 0x13e   : > { %v2293_v44 = vpop.f32.mrf.mxu0  ;;  %v883_v50 = vpop.f32.mrf.mxu1 }
 0x13f   : > { %v787_v46 = vadd.f32 %v2292_v41, %v3159_v34  ;;  %v943_v47 = vmax.f32 %v3162_v43, 0.0 }
 0x140   : > { %v2294_v48 = vpop.f32.mrf.mxu0  ;;  %v3176_v59 = vpop.f32.mrf.mxu1 }
 0x141   : > { %v2295_v49 = vadd.f32 %v2294_v48, %v2293_v44  ;;  %v3166_v51 = vadd.f32 %v883_v50, %v787_v46  ;;  %959 = vadd.xlane.f32.xlu0 %v943_v47 }
 0x142   : > { %v2296_v52 = vpop.f32.mrf.mxu0  ;;  %v896_v1 = vpop.f32.mrf.mxu1 }
 0x143   : > { %v792_v53 = vadd.f32 %v2295_v49, %v3159_v34  ;;  %v944_v54 = vmax.f32 %v3166_v51, 0.0 }
 0x144   : > { %v2297_v55 = vpop.f32.mrf.mxu0  ;;  %v2463_v40 = vpop.f32.mrf.mxu1 }
 0x145   : > { %v2298_v56 = vadd.f32 %v2297_v55, %v2296_v52  ;;  %v3172_v57 = vadd.f32 %v2458_v38, %v792_v53  ;;  %961 = vadd.xlane.f32.xlu0 %v944_v54 }
 0x146   : > { %v2299_v58 = vpop.f32.mrf.mxu0  ;;  %v899_v42 = vpop.f32.mrf.mxu1 }
 0x147   : > { %v795_v60 = vadd.f32 %v2298_v56, %v3159_v34  ;;  %v945_v61 = vmax.f32 %v3172_v57, 0.0 }
 0x148   : > { %v2300_v62 = vpop.f32.mrf.mxu0  ;;  %v2466_v44 = vpop.f32.mrf.mxu1 }
 0x149   : > { %v2301_v63 = vadd.f32 %v2300_v62, %v2299_v58  ;;  %963 = vadd.xlane.f32.xlu1 %v945_v61  ;;  %v3183_v0 = vadd.f32 %v2459_v45, %v795_v60 }
 0x14a   : > { %v2302_v2 = vpop.f32.mrf.mxu0  ;;  %v912_v46 = vpop.f32.mrf.mxu1 }
 0x14b   : > { %v800_v3 = vadd.f32 %v2301_v63, %v3159_v34  ;;  %v946_v4 = vmax.f32 %v3183_v0, 0.0  ;;  %v2672_v0 = vld [vmem:[#allocation7 + $0x70] sm:$0xff]  }
 0x14c   : > { %v2303_v5 = vpop.f32.mrf.mxu0  ;;  %v2467_v49 = vpop.f32.mrf.mxu1 }
 0x14d   : > { %v3188_v6 = vadd.f32 %v896_v1, %v800_v3  ;;  %965 = vadd.xlane.f32.xlu1 %v946_v4  ;;  %v2304_v52 = vadd.f32 %v2303_v5, %v2302_v2 }
 0x14e   : > { %v2305_v7 = vpop.f32.mrf.mxu0  ;;  %v915_v56 = vpop.f32.mrf.mxu1 }
 0x14f   : > { %v947_v8 = vmax.f32 %v3188_v6, 0.0  ;;  %v803_v63 = vadd.f32 %v2304_v52, %v3159_v34  ;;  %v2676_v6 = vld [vmem:[#allocation7 + $0x60] sm:$0xff]  }
 0x150   : > { %v2306_v11 = vpop.f32.mrf.mxu0  ;;  %v2470_v10 = vpop.f32.mrf.mxu1 }
 0x151   : > { %967 = vadd.xlane.f32.xlu0 %v947_v8  ;;  %v2307_v53 = vadd.f32 %v2306_v11, %v2305_v7  ;;  %v3222_v19 = vadd.f32 %v899_v42, %v803_v63 }
 0x152   : > { %v2308_v13 = vpop.f32.mrf.mxu0 }
 0x153   : > { %v808_v60 = vadd.f32 %v2307_v53, %v3159_v34  ;;  %v948_v22 = vmax.f32 %v3222_v19, 0.0  ;;  %v321_v19 = vadd.s32 48, %v3150_v30 }
 0x154   : > { %v2309_v16 = vpop.f32.mrf.mxu0 }
 0x155   : > { %v2310_v62 = vadd.f32 %v2309_v16, %v2308_v13  ;;  %v3225_v2 = vadd.f32 %v3176_v59, %v808_v60  ;;  %vm341_vm12 = vcmp.lt.s32.totalorder %v321_v19, %v3200_v12 }
 0x156   : > { %v2311_v17 = vpop.f32.mrf.mxu0 }
 0x157   : > { %v811_v15 = vadd.f32 %v2310_v62, %v3159_v34 }
 0x158   : > { %v2312_v21 = vpop.f32.mrf.mxu0 }
 0x159   : > { %v2313_v55 = vadd.f32 %v2312_v21, %v2311_v17  ;;  %v928_v17 = vpop.f32.mrf.mxu1  ;;  %v3231_v21 = vadd.f32 %v2463_v40, %v811_v15 }
 0x15a   : > { %v2314_v24 = vpop.f32.mrf.mxu0 }
 0x15b   : > { %v816_v9 = vadd.f32 %v2313_v55, %v3159_v34  ;;  %v2471_v33 = vpop.f32.mrf.mxu1 }
 0x15c   : > { %v2315_v28 = vpop.f32.mrf.mxu0 }
 0x15d   : > { %v2316_v1 = vadd.f32 %v2315_v28, %v2314_v24  ;;  %v3229_v16 = vadd.f32 %v912_v46, %v816_v9 }
 0x15e   : > { %2604 = vperm.xlu1 %2602, %v2603_v23   ;;  %v2317_v31 = vpop.f32.mrf.mxu0  ;;  %v949_v23 = vmax.f32 %v3225_v2, 0.0  ;;  %v322_v2 = vadd.s32 56, %v3150_v30 }
 0x15f   : > { %v819_v11 = vadd.f32 %v2316_v1, %v3159_v34  ;;  %v951_v28 = vmax.f32 %v3229_v16, 0.0 }
 0x160   : > { %v2318_v36 = vpop.f32.mrf.mxu0  ;;  %vm342_vm13 = vcmp.lt.s32.totalorder %v322_v2, %v3200_v12 }
 0x161   : > { %v2319_v3 = vadd.f32 %v2318_v36, %v2317_v31  ;;  %v3236_v59 = vadd.f32 %v915_v56, %v819_v11  ;;  %v950_v36 = vmax.f32 %v3231_v21, 0.0 }
 0x162   : > { %2609 = vperm.xlu1 %2602, %v2608_v29   ;;  %v2320_v38 = vpop.f32.mrf.mxu0 }
 0x163   : > { %v824_v13 = vadd.f32 %v2319_v3, %v3159_v34 }
 0x164   : > { %v2321_v39 = vpop.f32.mrf.mxu0 }
 0x165   : > { %v2322_v5 = vadd.f32 %v2321_v39, %v2320_v38  ;;  %v3239_v27 = vadd.f32 %v2466_v44, %v824_v13  ;;  %v952_v38 = vmax.f32 %v3236_v59, 0.0 }
 0x166   : > { %v2323_v41 = vpop.f32.mrf.mxu0 }
 0x167   : > { %2598 = vperm.xlu0 %2596, %v2597_v37   ;;  %v827_v24 = vadd.f32 %v2322_v5, %v3159_v34  ;;  %v953_v40 = vmax.f32 %v3239_v27, 0.0 }
 0x168   : > { %v2324_v45 = vpop.f32.mrf.mxu0 }
 0x169   : > { %v2325_v7 = vadd.f32 %v2324_v45, %v2323_v41  ;;  %v3247_v37 = vadd.f32 %v2467_v49, %v827_v24  ;;  %v931_v45 = vpop.f32.mrf.mxu1  ;;  %v2674_v24 = vld [vmem:[#allocation7 + $0x68] sm:$0xff]  }
 0x16a   : > { %v2326_v48 = vpop.f32.mrf.mxu0 }
 0x16b   : > { %v832_v25 = vadd.f32 %v2325_v7, %v3159_v34  ;;  %v954_v46 = vmax.f32 %v3247_v37, 0.0 }
 0x16c   : > { %v2327_v50 = vpop.f32.mrf.mxu0 }
 0x16d   : > { %v2328_v29 = vadd.f32 %v2327_v50, %v2326_v48  ;;  %v3250_v39 = vadd.f32 %v928_v17, %v832_v25  ;;  %v2670_v17 = vld [vmem:[#allocation7 + $0x78] sm:$0xff]   ;;  %v2675_v25 = vld [vmem:[#allocation7 + $0x28] sm:$0xff]  }
 0x16e   : > { %v2329_v58 = vpop.f32.mrf.mxu0  ;;  %2351 = vmatprep.subr.bf16.mxu1 %v2670_v17  ;;  %v2686_v17 = vld [vmem:[#allocation7 + $0xb8] sm:$0xff]  }
 0x16f   : > { %v835_v44 = vadd.f32 %v2328_v29, %v3159_v34  ;;  %v955_v48 = vmax.f32 %v3250_v39, 0.0  ;;  %v2678_v29 = vld [vmem:[#allocation7 + $0x58] sm:$0xff]   ;;  %2472 = vmatprep.subr.bf16.mxu0 %v2686_v17 }
 0x170   : > { %v2330_v14 = vpop.f32.mrf.mxu0  ;;  %2473 = vmatpush3.bf16.msra.mxu0 %v2686_v17 }
 0x171   : > { %v2331_v31 = vadd.f32 %v2330_v14, %v2329_v58  ;;  %v3266_v50 = vadd.f32 %v931_v45, %v835_v44  ;;  %v2684_v44 = vld [vmem:[#allocation7 + $0x40] sm:$0xff]  }
 0x172   : > { %v2332_v20 = vpop.f32.mrf.mxu0  ;;  %v2685_v45 = vld [vmem:[#allocation7] sm:$0xff]  }
 0x173   : > { %v840_v41 = vadd.f32 %v2331_v31, %v3159_v34  ;;  %v956_v53 = vmax.f32 %v3266_v50, 0.0  ;;  %v2679_v31 = vld [vmem:[#allocation7 + $0x18] sm:$0xff]   ;;  %v327_v50 = vadd.s32 96, %v3150_v30 }
 0x174   : > { %v2333_v35 = vpop.f32.mrf.mxu0 }
 0x175   : > { %v2334_v42 = vadd.f32 %v2333_v35, %v2332_v20  ;;  %v3268_v52 = vadd.f32 %v2470_v10, %v840_v41  ;;  %v2671_v20 = vld [vmem:[#allocation7 + $0x38] sm:$0xff]   ;;  %v2681_v35 = vld [vmem:[#allocation7 + $0x10] sm:$0xff]   ;;  %v2682_v41 = vld [vmem:[#allocation7 + $0x48] sm:$0xff]   ;;  %vm347_vm1 = vcmp.lt.s32.totalorder %v327_v50, %v3200_v12 }
 0x176   : > { %2352 = vmatpush3.bf16.msra.mxu1 %v2671_v20 }
 0x177   : > { %v843_v49 = vadd.f32 %v2334_v42, %v3159_v34  ;;  %v957_v55 = vmax.f32 %v3268_v52, 0.0  ;;  %2353 = vmatprep.subr.bf16.mxu1 %v2672_v0  ;;  %v2683_v42 = vld [vmem:[#allocation7 + $0x8] sm:$0xff]   ;;  %v2687_v0 = vld [vmem:[#allocation7 + $0xb0] sm:$0xff]  }
 0x178   : > { %2474 = vmatprep.subr.bf16.mxu0 %v2687_v0 }
 0x179   : > { %v3276_v56 = vadd.f32 %v2471_v33, %v843_v49  ;;  %v2680_v33 = vld [vmem:[#allocation7 + $0x50] sm:$0xff]   ;;  %2475 = vmatpush3.bf16.msra.mxu0 %v2687_v0 }
 0x17b   : > { %v958_v34 = vmax.f32 %v3276_v56, 0.0 }
 0x186   : > { %969 = vadd.xlane.f32.xlu1 %v948_v22  ;;  %971 = vadd.xlane.f32.xlu0 %v949_v23 }
 0x18a   : > { %973 = vadd.xlane.f32.xlu1 %v950_v36  ;;  %975 = vadd.xlane.f32.xlu0 %v951_v28 }
 0x18e   : > { %977 = vadd.xlane.f32.xlu1 %v952_v38  ;;  %979 = vadd.xlane.f32.xlu0 %v953_v40 }
 0x192   : > { %981 = vadd.xlane.f32.xlu1 %v954_v46  ;;  %983 = vadd.xlane.f32.xlu0 %v955_v48 }
 0x196   : > { %985 = vadd.xlane.f32.xlu1 %v956_v53  ;;  %987 = vadd.xlane.f32.xlu0 %v957_v55 }
 0x19a   : > { %989 = vadd.xlane.f32.xlu1 %v958_v34 }
 0x1ca   : > { %v960_v58 = vpop.xlane.xlu0 %959 }
 0x1cb   : > { %v992_v60 = vmul.f32 0.0078125, %v960_v58 }
 0x1cd   : > { %v3287_v62 = vsub.f32 %v943_v47, %v992_v60 }
 0x1ce   : > { %v962_v63 = vpop.xlane.xlu0 %961 }
 0x1cf   : > { %v993_v1 = vmul.f32 0.0078125, %v962_v63  ;;  %v1024_v3 = vmul.f32 %v3287_v62, %v3287_v62 }
 0x1d1   : > { %v3293_v9 = vsub.f32 %v944_v54, %v993_v1  ;;  %1040 = vadd.xlane.f32.xlu0 %v1024_v3 }
 0x1d2   : > { %v964_v10 = vpop.xlane.xlu1 %963 }
 0x1d3   : > { %v994_v14 = vmul.f32 0.0078125, %v964_v10  ;;  %v1025_v15 = vmul.f32 %v3293_v9, %v3293_v9 }
 0x1d5   : > { %v3299_v43 = vsub.f32 %v945_v61, %v994_v14  ;;  %1042 = vadd.xlane.f32.xlu1 %v1025_v15 }
 0x1d6   : > { %v966_v47 = vpop.xlane.xlu1 %965 }
 0x1d7   : > { %v995_v5 = vmul.f32 0.0078125, %v966_v47  ;;  %v1026_v7 = vmul.f32 %v3299_v43, %v3299_v43 }
 0x1d9   : > { %v3305_v51 = vsub.f32 %v946_v4, %v995_v5  ;;  %1044 = vadd.xlane.f32.xlu0 %v1026_v7  ;;  %v2673_v4 = vld [vmem:[#allocation7 + $0x30] sm:$0xff]   ;;  %v323_v7 = vadd.s32 64, %v3150_v30 }
 0x1da   : > { %v968_v54 = vpop.xlane.xlu0 %967  ;;  %2354 = vmatpush3.bf16.msra.mxu1 %v2673_v4  ;;  %v3316_v49 = vpop.permute.xlu1 %2604  ;;  %v2688_v4 = vld [vmem:[#allocation7 + $0xa8] sm:$0xff]  }
 0x1db   : > { %v996_v11 = vmul.f32 0.0078125, %v968_v54  ;;  %v1027_v13 = vmul.f32 %v3305_v51, %v3305_v51  ;;  %2355 = vmatprep.subr.bf16.mxu1 %v2674_v24  ;;  %v324_v54 = vadd.s32 72, %v3150_v30  ;;  %vm343_vm10 = vcmp.lt.s32.totalorder %v323_v7, %v3200_v12  ;;  %2476 = vmatprep.subr.bf16.mxu0 %v2688_v4  ;;  %v2689_v24 = vld [vmem:[#allocation7 + $0xa0] sm:$0xff]  }
 0x1dc   : > { %2477 = vmatpush3.bf16.msra.mxu0 %v2688_v4  ;;  %v3988_v50 = vunpack.i.h.bf16 %v3316_v49 }
 0x1dd   : > { %v3311_v57 = vsub.f32 %v947_v8, %v996_v11  ;;  %1046 = vadd.xlane.f32.xlu1 %v1027_v13  ;;  %v2677_v8 = vld [vmem:[#allocation7 + $0x20] sm:$0xff]   ;;  %vm344_vm11 = vcmp.lt.s32.totalorder %v324_v54, %v3200_v12  ;;  %v2201_v13 = vsel %vm341_vm12, 1.0, %v4001_v18  ;;  %2478 = vmatprep.subr.bf16.mxu0 %v2689_v24 }
 0x1de   : > { %2356 = vmatpush3.bf16.msra.mxu1 %v2675_v25  ;;  %v3320_v60 = vpop.permute.xlu1 %2609 }
 0x1df   : > { %v1028_v61 = vmul.f32 %v3311_v57, %v3311_v57  ;;  %2357 = vmatprep.subr.bf16.mxu1 %v2676_v6 }
 0x1e0   : > { %2479 = vmatpush3.bf16.msra.mxu0 %v2689_v24 }
 0x1e1   : > { %1048 = vadd.xlane.f32.xlu0 %v1028_v61  ;;  %v2202_v61 = vsel %vm342_vm13, 1.0, %v4001_v18 }
 0x1e2   : > { %2358 = vmatpush3.bf16.msra.mxu1 %v2677_v8  ;;  %v3318_v58 = vpop.permute.xlu0 %2598  ;;  %v2613_v20 = vpack.i.bf16 %v2202_v61, %v2201_v13  ;;  %v2690_v8 = vld [vmem:[#allocation7 + $0x98] sm:$0xff]   ;;  %v326_v61 = vadd.s32 88, %v3150_v30 }
 0x1e3   : > { %2359 = vmatprep.subr.bf16.mxu1 %v2678_v29  ;;  %2480 = vmatprep.subr.bf16.mxu0 %v2690_v8 }
 0x1e4   : > { %2481 = vmatpush3.bf16.msra.mxu0 %v2690_v8  ;;  %vm346_vm15 = vcmp.lt.s32.totalorder %v326_v61, %v3200_v12 }
 0x1e5   : > { %v2206_v8 = vsel %vm346_vm15, 1.0, %v4001_v18 }
 0x1e6   : > { %2360 = vmatpush3.bf16.msra.mxu1 %v2679_v31  ;;  %v2691_v31 = vld [vmem:[#allocation7 + $0x90] sm:$0xff]  }
 0x1e7   : > { %2361 = vmatprep.subr.bf16.mxu1 %v2680_v33  ;;  %2482 = vmatprep.subr.bf16.mxu0 %v2691_v31 }
 0x1e8   : > { %2483 = vmatpush3.bf16.msra.mxu0 %v2691_v31 }
 0x1ea   : > { %2362 = vmatpush3.bf16.msra.mxu1 %v2681_v35  ;;  %v2692_v35 = vld [vmem:[#allocation7 + $0x88] sm:$0xff]  }
 0x1eb   : > { %2363 = vmatprep.subr.bf16.mxu1 %v2682_v41  ;;  %v2693_v41 = vld [vmem:[#allocation7 + $0x80] sm:$0xff]   ;;  %2484 = vmatprep.subr.bf16.mxu0 %v2692_v35 }
 0x1ec   : > { %2485 = vmatpush3.bf16.msra.mxu0 %v2692_v35  ;;  %v2207_v35 = vsel %vm347_vm1, 1.0, %v4001_v18 }
 0x1ed   : > { %2486 = vmatprep.subr.bf16.mxu0 %v2693_v41 }
 0x1ee   : > { %2364 = vmatpush3.bf16.msra.mxu1 %v2683_v42 }
 0x1ef   : > { %2365 = vmatprep.subr.bf16.mxu1 %v2684_v44 }
 0x1f0   : > { %2487 = vmatpush3.bf16.msra.mxu0 %v2693_v41 }
 0x1f2   : > { %2366 = vmatpush3.bf16.msra.mxu1 %v2685_v45 }
 0x1f3   : > { %2504 = vmatprep.subr.bf16.mxu1 %v4001_v18 }
 0x20f   : > { %v970_v63 = vpop.xlane.xlu1 %969  ;;  %v972_v1 = vpop.xlane.xlu0 %971 }
 0x210   : > { %v997_v3 = vmul.f32 0.0078125, %v970_v63  ;;  %v998_v10 = vmul.f32 0.0078125, %v972_v1 }
 0x212   : > { %v3324_v14 = vsub.f32 %v948_v22, %v997_v3  ;;  %v3328_v15 = vsub.f32 %v949_v23, %v998_v10  ;;  %v2203_v22 = vsel %vm343_vm10, 1.0, %v4001_v18  ;;  %v2204_v23 = vsel %vm344_vm11, 1.0, %v4001_v18 }
 0x213   : > { %v2618_v11 = vpack.i.bf16 %v2204_v23, %v2203_v22  ;;  %v974_v25 = vpop.xlane.xlu1 %973  ;;  %v976_v6 = vpop.xlane.xlu0 %975 }
 0x214   : > { %v1029_v47 = vmul.f32 %v3324_v14, %v3324_v14  ;;  %v1030_v5 = vmul.f32 %v3328_v15, %v3328_v15  ;;  %v999_v45 = vmul.f32 0.0078125, %v974_v25  ;;  %v1000_v1 = vmul.f32 0.0078125, %v976_v6 }
 0x216   : > { %1050 = vadd.xlane.f32.xlu1 %v1029_v47  ;;  %1052 = vadd.xlane.f32.xlu0 %v1030_v5  ;;  %v3348_v3 = vsub.f32 %v950_v36, %v999_v45  ;;  %v3356_v7 = vsub.f32 %v951_v28, %v1000_v1 }
 0x217   : > { %v978_v29 = vpop.xlane.xlu1 %977  ;;  %v980_v33 = vpop.xlane.xlu0 %979 }
 0x218   : > { %v1001_v54 = vmul.f32 0.0078125, %v978_v29  ;;  %v1031_v21 = vmul.f32 %v3348_v3, %v3348_v3  ;;  %v1002_v37 = vmul.f32 0.0078125, %v980_v33  ;;  %v1032_v39 = vmul.f32 %v3356_v7, %v3356_v7 }
 0x21a   : > { %v3368_v16 = vsub.f32 %v952_v38, %v1001_v54  ;;  %v3380_v22 = vsub.f32 %v953_v40, %v1002_v37  ;;  %v325_v40 = vadd.s32 80, %v3150_v30 }
 0x21b   : > { %v982_v42 = vpop.xlane.xlu1 %981  ;;  %v984_v44 = vpop.xlane.xlu0 %983 }
 0x21c   : > { %v1003_v63 = vmul.f32 0.0078125, %v982_v42  ;;  %v1004_v47 = vmul.f32 0.0078125, %v984_v44  ;;  %v1033_v38 = vmul.f32 %v3368_v16, %v3368_v16  ;;  %v1034_v23 = vmul.f32 %v3380_v22, %v3380_v22 }
 0x21d   : > { %vm345_vm14 = vcmp.lt.s32.totalorder %v325_v40, %v3200_v12 }
 0x21e   : > { %v3352_v10 = vsub.f32 %v954_v46, %v1003_v63  ;;  %v3360_v19 = vsub.f32 %v955_v48, %v1004_v47  ;;  %v2205_v24 = vsel %vm345_vm14, 1.0, %v4001_v18  ;;  %v1138_v63 = vsub.s32 1, %v3150_v30 }
 0x21f   : > { %v988_v5 = vpop.xlane.xlu0 %987  ;;  %v986_v48 = vpop.xlane.xlu1 %985  ;;  %v2623_v33 = vpack.i.bf16 %v2206_v8, %v2205_v24 }
 0x220   : > { %v1006_v2 = vmul.f32 0.0078125, %v988_v5  ;;  %v1035_v36 = vmul.f32 %v3352_v10, %v3352_v10  ;;  %v1036_v46 = vmul.f32 %v3360_v19, %v3360_v19  ;;  %v1005_v59 = vmul.f32 0.0078125, %v986_v48 }
 0x221   : > { %v3410_v47 = vrot.slane %v3156_v32, %v1138_v63  ;;  %v1158_v5 = vsub.s32 2, %v3150_v30 }
 0x222   : > { %v3372_v28 = vsub.f32 %v957_v55, %v1006_v2  ;;  %v3388_v55 = vsub.f32 %v956_v53, %v1005_v59  ;;  %v328_v53 = vadd.s32 104, %v3150_v30 }
 0x224   : > { %v1038_v52 = vmul.f32 %v3372_v28, %v3372_v28  ;;  %v1037_v27 = vmul.f32 %v3388_v55, %v3388_v55  ;;  %vm348_vm4 = vcmp.lt.s32.totalorder %v328_v53, %v3200_v12  ;;  %v3987_v53 = vunpack.i.l.bf16 %v3316_v49 }
 0x225   : > { %v2208_v41 = vsel %vm348_vm4, 1.0, %v4001_v18 }
 0x226   : > { %v2628_v45 = vpack.i.bf16 %v2208_v41, %v2207_v35 }
 0x227   : > { %2619 = vperm.xlu1 %2602, %v2618_v11   ;;  %v3395_v11 = vpop.xlane.xlu1 %989 }
 0x228   : > { %v1007_v41 = vmul.f32 0.0078125, %v3395_v11  ;;  %v329_v11 = vadd.s32 112, %v3150_v30 }
 0x22a   : > { %vm349_vm5 = vcmp.lt.s32.totalorder %v329_v11, %v3200_v12 }
 0x22c   : > { %2614 = vperm.xlu0 %2596, %v2613_v20  }
 0x24b   : > { %1054 = vadd.xlane.f32.xlu1 %v1031_v21  ;;  %1062 = vadd.xlane.f32.xlu0 %v1035_v36  ;;  %v3416_v36 = vrot.slane %v3156_v32, %v1158_v5 }
 0x24f   : > { %1056 = vadd.xlane.f32.xlu1 %v1032_v39  ;;  %1064 = vadd.xlane.f32.xlu0 %v1036_v46 }
 0x253   : > { %1058 = vadd.xlane.f32.xlu1 %v1033_v38  ;;  %1068 = vadd.xlane.f32.xlu0 %v1038_v52  ;;  %v3986_v52 = vunpack.i.h.bf16 %v3318_v58 }
 0x257   : > { %1060 = vadd.xlane.f32.xlu1 %v1034_v23  ;;  %v3985_v23 = vunpack.i.l.bf16 %v3318_v58 }
 0x25a   : > { %v1041_v13 = vpop.xlane.xlu0 %1040 }
 0x25b   : > { %1066 = vadd.xlane.f32.xlu1 %v1037_v27  ;;  %v1072_v17 = vmul.f32 0.0078125, %v1041_v13 }
 0x25d   : > { %v1088_v20 = vadd.f32 1e-05, %v1072_v17 }
 0x25e   : > { %v1043_v0 = vpop.xlane.xlu1 %1042 }
 0x25f   : > { %2694 = vrsqrt.f32 %v1088_v20  ;;  %v1073_v4 = vmul.f32 0.0078125, %v1043_v0 }
 0x261   : > { %v1089_v25 = vadd.f32 1e-05, %v1073_v4 }
 0x262   : > { %v1045_v6 = vpop.xlane.xlu0 %1044 }
 0x263   : > { %v1074_v29 = vmul.f32 0.0078125, %v1045_v6  ;;  %2696 = vrsqrt.f32 %v1089_v25 }
 0x265   : > { %v1090_v31 = vadd.f32 1e-05, %v1074_v29 }
 0x266   : > { %v1047_v42 = vpop.xlane.xlu1 %1046 }
 0x267   : > { %2698 = vrsqrt.f32 %v1090_v31  ;;  %v1075_v44 = vmul.f32 0.0078125, %v1047_v42 }
 0x269   : > { %v1091_v1 = vadd.f32 1e-05, %v1075_v44  ;;  %2624 = vperm.xlu0 %2596, %v2623_v33  }
 0x26b   : > { %2700 = vrsqrt.f32 %v1091_v1 }
 0x26c   : > { %2629 = vperm.xlu1 %2602, %v2628_v45   ;;  %v2695_v54 = vpop.eup %2694  ;;  %v3446_v45 = vsub.f32 %v958_v34, %v1007_v41  ;;  %v2209_v34 = vsel %vm349_vm5, 1.0, %v4001_v18 }
 0x26d   : > { %v1120_v2 = vmul.f32 %v2695_v54, %v3287_v62 }
 0x26e   : > { %v1039_v54 = vmul.f32 %v3446_v45, %v3446_v45 }
 0x26f   : > { %v1140_v21 = vmul.f32 %v3410_v47, %v1120_v2  ;;  %v1049_v2 = vpop.xlane.xlu0 %1048 }
 0x270   : > { %v2697_v37 = vpop.eup %2696 }
 0x271   : > { %v1121_v39 = vmul.f32 %v2697_v37, %v3293_v9  ;;  %v1160_v59 = vadd.f32 %v3416_v36, %v1140_v21  ;;  %v330_v21 = vadd.s32 120, %v3150_v30  ;;  %v1076_v37 = vmul.f32 0.0078125, %v1049_v2 }
 0x273   : > { %v1141_v48 = vmul.f32 %v3410_v47, %v1121_v39  ;;  %v1256_v40 = vmul.f32 %v3985_v23, %v1160_v59  ;;  %vm350_vm6 = vcmp.lt.s32.totalorder %v330_v21, %v3200_v12  ;;  %v1092_v56 = vadd.f32 1e-05, %v1076_v37 }
 0x274   : > { %v2699_v46 = vpop.eup %2698  ;;  %v2210_v39 = vsel %vm350_vm6, 1.0, %v4001_v18 }
 0x275   : > { %v1122_v38 = vmul.f32 %v2699_v46, %v3299_v43  ;;  %v1161_v62 = vadd.f32 %v3416_v36, %v1141_v48  ;;  %2702 = vrsqrt.f32 %v1092_v56  ;;  %v2633_v46 = vpack.i.bf16 %v2210_v39, %v2209_v34 }
 0x277   : > { %v1142_v27 = vmul.f32 %v3410_v47, %v1122_v38  ;;  %v1257_v9 = vmul.f32 %v3986_v52, %v1161_v62  ;;  %v3609_v52 = vld [vmem:[%s3977_s5] sm:$0xff] }
 0x278   : > { %v2701_v32 = vpop.eup %2700 }
 0x279   : > { %v1123_v13 = vmul.f32 %v2701_v32, %v3305_v51  ;;  %v1272_v61 = vpack.c.bf16 %v1257_v9, %v1256_v40  ;;  %v1162_v17 = vadd.f32 %v3416_v36, %v1142_v27 }
 0x27b   : > { %v1143_v43 = vmul.f32 %v3410_v47, %v1123_v13  ;;  %v1281_v20 = vshrl.u32 %v1272_v61, 16  ;;  %1609 = vmatprep.mubr.bf16.mxu1 %v1272_v61  ;;  %v1284_v24 = vshll.u32 %v1272_v61, 16  ;;  %v1258_v25 = vmul.f32 %v3987_v53, %v1162_v17 }
 0x27c   : > { %v3990_v61 = vunpack.i.h.bf16 %v3320_v60 }
 0x27d   : > { %v1163_v0 = vadd.f32 %v3416_v36, %v1143_v43  ;;  %v1283_v4 = vrot.slane %v1281_v20, 7  ;;  %v3989_v43 = vunpack.i.l.bf16 %v3320_v60 }
 0x27f   : > { %v1259_v51 = vmul.f32 %v3988_v50, %v1163_v0  ;;  %v1286_v6 = vor.u32 %v1284_v24, %v1283_v4 }
 0x281   : > { %v1273_v8 = vpack.c.bf16 %v1259_v51, %v1258_v25  ;;  %v1352_v29 = vsel %vm3105_vm2, 0, %v1286_v6 }
 0x282   : > { %1610 = vmatmul.mubr.bf16.vlgmr.msra.gmra.mxu1 %v1352_v29  ;;  %v1356_v1 = vrot.slane %v1352_v29, 1  ;;  %v2703_v62 = vpop.eup %2702 }
 0x283   : > { %v1288_v31 = vshrl.u32 %v1273_v8, 16  ;;  %1617 = vmatprep.mubr.bf16.mxu1 %v1273_v8  ;;  %v1291_v35 = vshll.u32 %v1273_v8, 16  ;;  %v1124_v27 = vmul.f32 %v2703_v62, %v3311_v57 }
 0x285   : > { %v1290_v33 = vrot.slane %v1288_v31, 7  ;;  %v1144_v32 = vmul.f32 %v3410_v47, %v1124_v27 }
 0x287   : > { %v1293_v42 = vor.u32 %v1291_v35, %v1290_v33  ;;  %v1164_v13 = vadd.f32 %v3416_v36, %v1144_v32 }
 0x289   : > { %v1294_v44 = vsel %vm440_vm0, %v1283_v4, %v1293_v42  ;;  %v1260_v20 = vmul.f32 %v3989_v43, %v1164_v13 }
 0x28a   : > { %v1357_v63 = vrot.slane %v1294_v44, 1  ;;  %1618 = vmatmul.mubr.bf16.gmra.mxu1 %v1294_v44 }
 0x28c   : > { %v1358_v5 = vsel %vm527_vm3, %v1356_v1, %v1357_v63 }
 0x28d   : > { %2488 = vmatprep.mubr.bf16.mxu0 %v1358_v5 }
 0x290   : > { %1070 = vadd.xlane.f32.xlu1 %v1039_v54 }
 0x29f   : > { %v1051_v48 = vpop.xlane.xlu1 %1050  ;;  %v1053_v29 = vpop.xlane.xlu0 %1052 }
 0x2a0   : > { %v1077_v59 = vmul.f32 0.0078125, %v1051_v48  ;;  %v1078_v31 = vmul.f32 0.0078125, %v1053_v29 }
 0x2a1   : > { %2634 = vperm.xlu1 %2602, %v2633_v46  }
 0x2a2   : > { %v1093_v38 = vadd.f32 1e-05, %v1077_v59  ;;  %v1094_v35 = vadd.f32 1e-05, %v1078_v31 }
 0x2a3   : > { %v3480_v41 = vpop.permute.xlu1 %2619 }
 0x2a4   : > { %2704 = vrsqrt.f32 %v1093_v38 }
 0x2a5   : > { %2706 = vrsqrt.f32 %v1094_v35 }
 0x2a7   : > { %v3482_v42 = vpop.permute.xlu0 %2614 }
 0x2b1   : > { %v2705_v40 = vpop.eup %2704 }
 0x2b2   : > { %v1125_v12 = vmul.f32 %v2705_v40, %v3324_v14  ;;  %v2707_v48 = vpop.eup %2706 }
 0x2b3   : > { %v1126_v62 = vmul.f32 %v2707_v48, %v3328_v15  ;;  %v3992_v15 = vunpack.i.h.bf16 %v3482_v42 }
 0x2b4   : > { %v1145_v9 = vmul.f32 %v3410_v47, %v1125_v12 }
 0x2b5   : > { %v1146_v12 = vmul.f32 %v3410_v47, %v1126_v62 }
 0x2b6   : > { %v1165_v17 = vadd.f32 %v3416_v36, %v1145_v9 }
 0x2b8   : > { %v1261_v57 = vmul.f32 %v3990_v61, %v1165_v17 }
 0x2ba   : > { %v1274_v0 = vpack.c.bf16 %v1261_v57, %v1260_v20 }
 0x2bc   : > { %v1296_v4 = vshrl.u32 %v1274_v0, 16  ;;  %1625 = vmatprep.mubr.bf16.mxu1 %v1274_v0  ;;  %v1299_v24 = vshll.u32 %v1274_v0, 16  ;;  %v1166_v0 = vadd.f32 %v3416_v36, %v1146_v12 }
 0x2be   : > { %v3469_v14 = vrot.slane %v1296_v4, 7 }
 0x2c0   : > { %v1301_v25 = vor.u32 %v1299_v24, %v3469_v14 }
 0x2c2   : > { %v3473_v51 = vsel %vm440_vm0, %v1290_v33, %v1301_v25  ;;  %v3991_v25 = vunpack.i.l.bf16 %v3482_v42 }
 0x2c3   : > { %v1359_v6 = vrot.slane %v3473_v51, 1  ;;  %1626 = vmatmul.mubr.bf16.gmra.mxu1 %v3473_v51 }
 0x2c5   : > { %v1360_v8 = vsel %vm527_vm3, %v1357_v63, %v1359_v6 }
 0x2c6   : > { %2489 = vmatmul.mubr.bf16.vlgmr.msra.gmra.mxu0 %v1360_v8 }
 0x2d4   : > { %v1055_v44 = vpop.xlane.xlu1 %1054  ;;  %v1063_v33 = vpop.xlane.xlu0 %1062 }
 0x2d5   : > { %v1079_v1 = vmul.f32 0.0078125, %v1055_v44  ;;  %v1083_v5 = vmul.f32 0.0078125, %v1063_v33 }
 0x2d7   : > { %v1095_v54 = vadd.f32 1e-05, %v1079_v1  ;;  %v1099_v2 = vadd.f32 1e-05, %v1083_v5 }
 0x2d8   : > { %v1057_v11 = vpop.xlane.xlu1 %1056  ;;  %v1065_v21 = vpop.xlane.xlu0 %1064 }
 0x2d9   : > { %2708 = vrsqrt.f32 %v1095_v54  ;;  %v1080_v37 = vmul.f32 0.0078125, %v1057_v11  ;;  %v1084_v63 = vmul.f32 0.0078125, %v1065_v21 }
 0x2da   : > { %2710 = vrsqrt.f32 %v1099_v2 }
 0x2db   : > { %v1096_v56 = vadd.f32 1e-05, %v1080_v37  ;;  %v1100_v34 = vadd.f32 1e-05, %v1084_v63 }
 0x2dc   : > { %v1059_v39 = vpop.xlane.xlu1 %1058  ;;  %v3499_v5 = vpop.xlane.xlu0 %1068 }
 0x2dd   : > { %2712 = vrsqrt.f32 %v1096_v56  ;;  %v1081_v46 = vmul.f32 0.0078125, %v1059_v39  ;;  %v3994_v56 = vunpack.i.h.bf16 %v3480_v41 }
 0x2de   : > { %2714 = vrsqrt.f32 %v1100_v34  ;;  %v3993_v34 = vunpack.i.l.bf16 %v3480_v41 }
 0x2df   : > { %v1097_v59 = vadd.f32 1e-05, %v1081_v46 }
 0x2e0   : > { %v1061_v38 = vpop.xlane.xlu1 %1060 }
 0x2e1   : > { %2716 = vrsqrt.f32 %v1097_v59  ;;  %v1082_v27 = vmul.f32 0.0078125, %v1061_v38 }
 0x2e3   : > { %v1098_v32 = vadd.f32 1e-05, %v1082_v27 }
 0x2e4   : > { %v1067_v40 = vpop.xlane.xlu1 %1066  ;;  %v3509_v46 = vpop.permute.xlu0 %2624 }
 0x2e5   : > { %2718 = vrsqrt.f32 %v1098_v32  ;;  %v1085_v9 = vmul.f32 0.0078125, %v1067_v40  ;;  %v3996_v12 = vunpack.i.h.bf16 %v3509_v46 }
 0x2e6   : > { %v2709_v13 = vpop.eup %2708 }
 0x2e7   : > { %v1101_v17 = vadd.f32 1e-05, %v1085_v9  ;;  %v1127_v20 = vmul.f32 %v2709_v13, %v3348_v3  ;;  %v2711_v57 = vpop.eup %2710  ;;  %v1262_v3 = vmul.f32 %v3991_v25, %v1166_v0  ;;  %v3995_v9 = vunpack.i.l.bf16 %v3509_v46 }
 0x2e8   : > { %v1131_v31 = vmul.f32 %v2711_v57, %v3352_v10 }
 0x2e9   : > { %2720 = vrsqrt.f32 %v1101_v17  ;;  %v1147_v4 = vmul.f32 %v3410_v47, %v1127_v20  ;;  %v3523_v20 = vpop.permute.xlu1 %2629 }
 0x2ea   : > { %v2713_v24 = vpop.eup %2712  ;;  %v1151_v11 = vmul.f32 %v3410_v47, %v1131_v31 }
 0x2eb   : > { %v1167_v8 = vadd.f32 %v3416_v36, %v1147_v4  ;;  %v1128_v29 = vmul.f32 %v2713_v24, %v3356_v7  ;;  %v2715_v35 = vpop.eup %2714 }
 0x2ec   : > { %v1132_v7 = vmul.f32 %v2715_v35, %v3360_v19  ;;  %v1171_v19 = vadd.f32 %v3416_v36, %v1151_v11 }
 0x2ed   : > { %v1263_v44 = vmul.f32 %v3992_v15, %v1167_v8  ;;  %v1148_v33 = vmul.f32 %v3410_v47, %v1128_v29 }
 0x2ee   : > { %v2717_v1 = vpop.eup %2716  ;;  %v1152_v38 = vmul.f32 %v3410_v47, %v1132_v7  ;;  %v1267_v4 = vmul.f32 %v3996_v12, %v1171_v19 }
 0x2ef   : > { %v1275_v54 = vpack.c.bf16 %v1263_v44, %v1262_v3  ;;  %v1129_v2 = vmul.f32 %v2717_v1, %v3368_v16  ;;  %v1168_v37 = vadd.f32 %v3416_v36, %v1148_v33  ;;  %v3997_v3 = vunpack.i.l.bf16 %v3523_v20 }
 0x2f0   : > { %v1172_v31 = vadd.f32 %v3416_v36, %v1152_v38 }
 0x2f1   : > { %v1304_v10 = vshrl.u32 %v1275_v54, 16  ;;  %1633 = vmatprep.mubr.bf16.mxu1 %v1275_v54  ;;  %v1149_v21 = vmul.f32 %v3410_v47, %v1129_v2  ;;  %v1307_v48 = vshll.u32 %v1275_v54, 16  ;;  %v1264_v32 = vmul.f32 %v3993_v34, %v1168_v37 }
 0x2f2   : > { %v2719_v63 = vpop.eup %2718  ;;  %v1268_v11 = vmul.f32 %v3997_v3, %v1172_v31 }
 0x2f3   : > { %v1130_v39 = vmul.f32 %v2719_v63, %v3380_v22  ;;  %v1306_v16 = vrot.slane %v1304_v10, 7  ;;  %v1169_v59 = vadd.f32 %v3416_v36, %v1149_v21 }
 0x2f5   : > { %v1150_v62 = vmul.f32 %v3410_v47, %v1130_v39  ;;  %v1309_v27 = vor.u32 %v1307_v48, %v1306_v16  ;;  %v1265_v40 = vmul.f32 %v3994_v56, %v1169_v59 }
 0x2f6   : > { %v2721_v22 = vpop.eup %2720 }
 0x2f7   : > { %v1170_v13 = vadd.f32 %v3416_v36, %v1150_v62  ;;  %v1133_v17 = vmul.f32 %v2721_v22, %v3388_v55  ;;  %v1310_v57 = vsel %vm440_vm0, %v3469_v14, %v1309_v27  ;;  %v1276_v0 = vpack.c.bf16 %v1265_v40, %v1264_v32 }
 0x2f8   : > { %v1361_v24 = vrot.slane %v1310_v57, 1  ;;  %1634 = vmatmul.mubr.bf16.gmra.mxu1 %v1310_v57  ;;  %v3998_v55 = vunpack.i.h.bf16 %v3523_v20 }
 0x2f9   : > { %v1266_v8 = vmul.f32 %v3995_v9, %v1170_v13  ;;  %v1153_v29 = vmul.f32 %v3410_v47, %v1133_v17  ;;  %v1312_v35 = vshrl.u32 %v1276_v0, 16  ;;  %1641 = vmatprep.mubr.bf16.mxu1 %v1276_v0  ;;  %v1315_v1 = vshll.u32 %v1276_v0, 16 }
 0x2fa   : > { %v1362_v14 = vsel %vm527_vm3, %v1359_v6, %v1361_v24  ;;  %v1086_v17 = vmul.f32 0.0078125, %v3499_v5 }
 0x2fb   : > { %v1173_v44 = vadd.f32 %v3416_v36, %v1153_v29  ;;  %2492 = vmatprep.mubr.bf16.mxu0 %v1362_v14  ;;  %v1314_v33 = vrot.slane %v1312_v35, 7  ;;  %v1277_v54 = vpack.c.bf16 %v1267_v4, %v1266_v8 }
 0x2fc   : > { %v1102_v57 = vadd.f32 1e-05, %v1086_v17 }
 0x2fd   : > { %v1269_v2 = vmul.f32 %v3998_v55, %v1173_v44  ;;  %v1317_v7 = vor.u32 %v1315_v1, %v1314_v33  ;;  %v1320_v10 = vshrl.u32 %v1277_v54, 16  ;;  %v1323_v51 = vshll.u32 %v1277_v54, 16 }
 0x2fe   : > { %2722 = vrsqrt.f32 %v1102_v57 }
 0x2ff   : > { %v1318_v21 = vsel %vm440_vm0, %v1306_v16, %v1317_v7  ;;  %v1322_v37 = vrot.slane %v1320_v10, 7  ;;  %v1278_v63 = vpack.c.bf16 %v1269_v2, %v1268_v11 }
 0x300   : > { %v1363_v6 = vrot.slane %v1318_v21, 1  ;;  %1642 = vmatmul.mubr.bf16.gmra.mxu1 %v1318_v21 }
 0x301   : > { %v1325_v39 = vor.u32 %v1323_v51, %v1322_v37  ;;  %1649 = vmatprep.mubr.bf16.mxu1 %v1277_v54  ;;  %v1328_v48 = vshrl.u32 %v1278_v63, 16  ;;  %v1331_v62 = vshll.u32 %v1278_v63, 16 }
 0x302   : > { %v1364_v59 = vsel %vm527_vm3, %v1361_v24, %v1363_v6 }
 0x303   : > { %2493 = vmatmul.mubr.bf16.gmra.mxu0 %v1364_v59  ;;  %v1326_v19 = vsel %vm440_vm0, %v1314_v33, %v1325_v39  ;;  %v1330_v38 = vrot.slane %v1328_v48, 7 }
 0x304   : > { %v1365_v27 = vrot.slane %v1326_v19, 1 }
 0x305   : > { %v1333_v32 = vor.u32 %v1331_v62, %v1330_v38 }
 0x306   : > { %v1366_v40 = vsel %vm527_vm3, %v1363_v6, %v1365_v27 }
 0x307   : > { %2496 = vmatprep.mubr.bf16.mxu0 %v1366_v40  ;;  %v1334_v16 = vsel %vm440_vm0, %v1322_v37, %v1333_v32 }
 0x308   : > { %1650 = vmatmul.mubr.bf16.gmra.mxu1 %v1326_v19  ;;  %v1367_v22 = vrot.slane %v1334_v16, 1 }
 0x309   : > { %1657 = vmatprep.mubr.bf16.mxu1 %v1278_v63 }
 0x30a   : > { %v1368_v13 = vsel %vm527_vm3, %v1365_v27, %v1367_v22 }
 0x30b   : > { %2497 = vmatmul.mubr.bf16.gmra.mxu0 %v1368_v13  ;;  %v2723_v8 = vpop.eup %2722 }
 0x30c   : > { %v1134_v29 = vmul.f32 %v2723_v8, %v3372_v28 }
 0x30e   : > { %v1154_v44 = vmul.f32 %v3410_v47, %v1134_v29 }
 0x310   : > { %1658 = vmatmul.mubr.bf16.gmra.mxu1 %v1334_v16  ;;  %v1174_v2 = vadd.f32 %v3416_v36, %v1154_v44 }
 0x319   : > { %v1071_v0 = vpop.xlane.xlu1 %1070 }
 0x31a   : > { %v1087_v4 = vmul.f32 0.0078125, %v1071_v0 }
 0x31c   : > { %v1103_v24 = vadd.f32 1e-05, %v1087_v4 }
 0x31d   : > { %v3551_v35 = vpop.permute.xlu1 %2634 }
 0x31e   : > { %2724 = vrsqrt.f32 %v1103_v24  ;;  %v4000_v5 = vunpack.i.l.bf16 %v3551_v35  ;;  %v3999_v54 = vunpack.i.h.bf16 %v3551_v35 }
 0x320   : > { %v1270_v11 = vmul.f32 %v4000_v5, %v1174_v2 }
 0x32b   : > { %v2725_v31 = vpop.eup %2724 }
 0x32c   : > { %v1135_v14 = vmul.f32 %v2725_v31, %v3446_v45 }
 0x32e   : > { %v1155_v33 = vmul.f32 %v3410_v47, %v1135_v14 }
 0x330   : > { %v1175_v1 = vadd.f32 %v3416_v36, %v1155_v33 }
 0x332   : > { %v1271_v28 = vmul.f32 %v3999_v54, %v1175_v1 }
 0x334   : > { %v1279_v7 = vpack.c.bf16 %v1271_v28, %v1270_v11 }
 0x336   : > { %v1336_v45 = vshrl.u32 %v1279_v7, 16  ;;  %1665 = vmatprep.mubr.bf16.mxu1 %v1279_v7  ;;  %v1339_v21 = vshll.u32 %v1279_v7, 16 }
 0x338   : > { %v1338_v10 = vrot.slane %v1336_v45, 7 }
 0x33a   : > { %v1341_v47 = vor.u32 %v1339_v21, %v1338_v10  ;;  %v1353_v37 = vsel %vm3105_vm2, %v1338_v10, 0 }
 0x33b   : > { %v1371_v36 = vrot.slane %v1353_v37, 1 }
 0x33c   : > { %v1342_v51 = vsel %vm440_vm0, %v1330_v38, %v1341_v47  ;;  %vm2916_vm0 = vmmov 0  }
 0x33d   : > { %v1369_v63 = vrot.slane %v1342_v51, 1  ;;  %1666 = vmatmul.mubr.bf16.gmra.mxu1 %v1342_v51 }
 0x33f   : > { %v1370_v6 = vsel %vm527_vm3, %v1367_v22, %v1369_v63  ;;  %v1372_v39 = vsel %vm527_vm3, %v1369_v63, %v1371_v36 }
 0x340   : > { %2500 = vmatprep.mubr.bf16.mxu0 %v1370_v6 }
 0x341   : > { %2501 = vmatmul.mubr.bf16.gmra.mxu0 %v1372_v39 }
 0x342   : > { %v2367_v48 = vpop.f32.mrf.mxu1 }
 0x344   : > { %v2368_v59 = vpop.f32.mrf.mxu1 }
 0x345   : > { %v3569_v19 = vadd.f32 %v2368_v59, %v2367_v48 }
 0x346   : > { %v2370_v62 = vpop.f32.mrf.mxu1 }
 0x348   : > { %v2371_v27 = vpop.f32.mrf.mxu1 }
 0x349   : > { %v3571_v32 = vadd.f32 %v2371_v27, %v2370_v62 }
 0x34a   : > { %v2373_v26 = vpop.f32.mrf.mxu1 }
 0x34c   : > { %v2374_v40 = vpop.f32.mrf.mxu1 }
 0x34d   : > { %v3573_v38 = vadd.f32 %v2374_v40, %v2373_v26  ;;  %v1431_v40 = vsub.s32 3, %v3150_v30 }
 0x34e   : > { %v2376_v16 = vpop.f32.mrf.mxu1 }
 0x34f   : > { %v3612_v53 = vrot.slane %v3609_v52, %v1431_v40 }
 0x350   : > { %v2377_v13 = vpop.f32.mrf.mxu1 }
 0x351   : > { %v3575_v17 = vadd.f32 %v2377_v13, %v2376_v16 }
 0x383   : > { %v3577_v22 = vpop.f32.mrf.mxu1 }
 0x385   : > { %v3579_v57 = vpop.f32.mrf.mxu1 }
 0x386   : > { %v3589_v33 = vpop.f32.mrf.mxu0 }
 0x387   : > { %v3581_v0 = vpop.f32.mrf.mxu1 }
 0x388   : > { %v3591_v2 = vpop.f32.mrf.mxu0 }
 0x389   : > { %v3583_v4 = vpop.f32.mrf.mxu1 }
 0x38a   : > { %v3593_v11 = vpop.f32.mrf.mxu0 }
 0x38c   : > { %v3595_v45 = vpop.f32.mrf.mxu0 }
 0x3b8   : > { %v2385_v24 = vpop.f32.mrf.mxu1 }
 0x3ba   : > { %v2386_v8 = vpop.f32.mrf.mxu1 }
 0x3bc   : > { %v3585_v29 = vpop.f32.mrf.mxu1 }
 0x3be   : > { %v3587_v31 = vpop.f32.mrf.mxu1 }
 0x3c0   : > { %v2391_v14 = vpop.f32.mrf.mxu1 }
 0x3c2   : > { %v2392_v44 = vpop.f32.mrf.mxu1 }
 0x3c3   : > { %v3597_v10 = vpop.f32.mrf.mxu0 }
 0x3c4   : > { %v2394_v1 = vpop.f32.mrf.mxu1 }
 0x3c5   : > { %v3599_v47 = vpop.f32.mrf.mxu0 }
 0x3c6   : > { %v2395_v28 = vpop.f32.mrf.mxu1 }
 0x3c7   : > { %v3601_v51 = vpop.f32.mrf.mxu0 }
 0x3c8   : > { %v2397_v7 = vpop.f32.mrf.mxu1 }
 0x3c9   : > { %v3603_v36 = vpop.f32.mrf.mxu0 }
 0x3ca   : > { %v2398_v21 = vpop.f32.mrf.mxu1 }
 0x3cb   : > { %v2498_v39 = vpop.f32.mrf.mxu0  ;;  %v2399_v61 = vadd.f32 %v2398_v21, %v2397_v7 }
 0x3cc   : > { %v2400_v37 = vpop.f32.mrf.mxu1 }
 0x3cd   : > { %v1740_v59 = vpop.f32.mrf.mxu0  ;;  %v1652_v5 = vadd.f32 %v2399_v61, %v3612_v53 }
 0x3ce   : > { %v2401_v63 = vpop.f32.mrf.mxu1 }
 0x3cf   : > { %v2499_v27 = vpop.f32.mrf.mxu0  ;;  %v2402_v40 = vadd.f32 %v2401_v63, %v2400_v37 }
 0x3d0   : > { %v2403_v6 = vpop.f32.mrf.mxu1 }
 0x3d1   : > { %v1743_v13 = vpop.f32.mrf.mxu0  ;;  %v1655_v61 = vadd.f32 %v2402_v40, %v3612_v53 }
 0x3d2   : > { %v2404_v48 = vpop.f32.mrf.mxu1 }
 0x3d3   : > { %v2405_v50 = vadd.f32 %v2404_v48, %v2403_v6 }
 0x3d4   : > { %v2406_v62 = vpop.f32.mrf.mxu1 }
 0x3d5   : > { %v1660_v54 = vadd.f32 %v2405_v50, %v3612_v53  ;;  %v3628_v50 = vadd.f32 %v2498_v39, %v1652_v5 }
 0x3d6   : > { %v2407_v26 = vpop.f32.mrf.mxu1 }
 0x3d7   : > { %v2408_v12 = vadd.f32 %v2407_v26, %v2406_v62 }
 0x3fd   : > { %v2409_v16 = vpop.f32.mrf.mxu1 }
 0x3ff   : > { %v2410_v23 = vpop.f32.mrf.mxu1 }
 0x400   : > { %v2411_v43 = vadd.f32 %v2410_v23, %v2409_v16  ;;  %v1623_v16 = vadd.f32 %v3575_v17, %v3612_v53 }
 0x401   : > { %v2412_v25 = vpop.f32.mrf.mxu1  ;;  %v2502_v15 = vpop.f32.mrf.mxu0 }
 0x402   : > { %v1668_v34 = vadd.f32 %v2411_v43, %v3612_v53  ;;  %v2393_v43 = vadd.f32 %v2392_v44, %v2391_v14 }
 0x403   : > { %v2413_v56 = vpop.f32.mrf.mxu1  ;;  %v1756_v9 = vpop.f32.mrf.mxu0 }
 0x404   : > { %v3615_v3 = vadd.f32 %v2502_v15, %v1668_v34  ;;  %v2414_v55 = vadd.f32 %v2413_v56, %v2412_v25  ;;  %v3620_v23 = vadd.f32 %v1756_v9, %v1660_v54  ;;  %v1663_v15 = vadd.f32 %v2408_v12, %v3612_v53 }
 0x405   : > { %v2503_v18 = vpop.f32.mrf.mxu0  ;;  %v2387_v9 = vadd.f32 %v2386_v8, %v2385_v24  ;;  %v1781_v12 = vmax.f32 %v3628_v50, 0.0  ;;  %v3643_v54 = vadd.f32 %v2499_v27, %v1655_v61  ;;  %v2381_v24 = vadd.f32 %v3579_v57, %v3577_v22 }
 0x406   : > { %v1785_v6 = vmax.f32 %v3615_v3, 0.0  ;;  %v1671_v7 = vadd.f32 %v2414_v55, %v3612_v53  ;;  %v1783_v25 = vmax.f32 %v3620_v23, 0.0  ;;  %v2396_v55 = vadd.f32 %v2395_v28, %v2394_v1 }
 0x407   : > { %v1759_v21 = vpop.f32.mrf.mxu0  ;;  %v2390_v8 = vadd.f32 %v3587_v31, %v3585_v29  ;;  %v1636_v44 = vadd.f32 %v2387_v9, %v3612_v53  ;;  %v1782_v22 = vmax.f32 %v3643_v54, 0.0  ;;  %v2384_v29 = vadd.f32 %v3583_v4, %v3581_v0 }
 0x408   : > { %v3623_v48 = vadd.f32 %v2503_v18, %v1671_v7  ;;  %1815 = vadd.xlane.f32.xlu1 %v1785_v6  ;;  %v3633_v34 = vadd.f32 %v1759_v21, %v1663_v15  ;;  %v1644_v18 = vadd.f32 %v2393_v43, %v3612_v53  ;;  %v1647_v1 = vadd.f32 %v2396_v55, %v3612_v53 }
 0x409   : > { %v3657_v28 = vadd.f32 %v3597_v10, %v1636_v44  ;;  %v1628_v31 = vadd.f32 %v2381_v24, %v3612_v53  ;;  %v1639_v63 = vadd.f32 %v2390_v8, %v3612_v53  ;;  %v1620_v4 = vadd.f32 %v3573_v38, %v3612_v53 }
 0x40a   : > { %v1786_v56 = vmax.f32 %v3623_v48, 0.0  ;;  %v3641_v5 = vadd.f32 %v1740_v59, %v1644_v18  ;;  %v1784_v14 = vmax.f32 %v3633_v34, 0.0  ;;  %v3661_v57 = vadd.f32 %v1743_v13, %v1647_v1 }
 0x40b   : > { %v1777_v10 = vmax.f32 %v3657_v28, 0.0  ;;  %v3673_v39 = vadd.f32 %v3599_v47, %v1628_v31  ;;  %v3676_v59 = vadd.f32 %v3601_v51, %v1639_v63  ;;  %v1631_v62 = vadd.f32 %v2384_v29, %v3612_v53 }
 0x40c   : > { %1817 = vadd.xlane.f32.xlu0 %v1786_v56  ;;  %1811 = vadd.xlane.f32.xlu1 %v1783_v25  ;;  %v1779_v37 = vmax.f32 %v3641_v5, 0.0  ;;  %v1780_v0 = vmax.f32 %v3661_v57, 0.0  ;;  %v3687_v27 = vadd.f32 %v3589_v33, %v1620_v4  ;;  %v1612_v38 = vadd.f32 %v3569_v19, %v3612_v53 }
 0x40d   : > { %v1775_v47 = vmax.f32 %v3673_v39, 0.0  ;;  %v1778_v51 = vmax.f32 %v3676_v59, 0.0  ;;  %v3692_v26 = vadd.f32 %v3603_v36, %v1631_v62  ;;  %v3707_v36 = vadd.f32 %v3593_v11, %v1623_v16 }
 0x40e   : > { %v1773_v33 = vmax.f32 %v3687_v27, 0.0  ;;  %v3704_v13 = vadd.f32 %v3591_v2, %v1612_v38  ;;  %v1615_v19 = vadd.f32 %v3571_v32, %v3612_v53 }
 0x40f   : > { %v1776_v40 = vmax.f32 %v3692_v26, 0.0  ;;  %v1774_v7 = vmax.f32 %v3707_v36, 0.0  ;;  %v4017_v36 = vmov 0.0  }
 0x410   : > { %1807 = vadd.xlane.f32.xlu0 %v1781_v12  ;;  %1813 = vadd.xlane.f32.xlu1 %v1784_v14  ;;  %v1771_v17 = vmax.f32 %v3704_v13, 0.0  ;;  %v3719_v2 = vadd.f32 %v3595_v45, %v1615_v19 }
 0x411   : > { %2520 = vmatprep.mubr.msk.bf16.mxu1 %vm2916_vm0, %v4017_v36 }
 0x412   : > { %v1772_v53 = vmax.f32 %v3719_v2, 0.0 }
 0x414   : > { %1809 = vadd.xlane.f32.xlu1 %v1782_v22  ;;  %1803 = vadd.xlane.f32.xlu0 %v1779_v37 }
 0x418   : > { %1805 = vadd.xlane.f32.xlu1 %v1780_v0  ;;  %1799 = vadd.xlane.f32.xlu0 %v1777_v10 }
 0x41c   : > { %1801 = vadd.xlane.f32.xlu1 %v1778_v51  ;;  %1795 = vadd.xlane.f32.xlu0 %v1775_v47 }
 0x420   : > { %1797 = vadd.xlane.f32.xlu1 %v1776_v40  ;;  %1791 = vadd.xlane.f32.xlu0 %v1773_v33 }
 0x424   : > { %1793 = vadd.xlane.f32.xlu1 %v1774_v7  ;;  %1787 = vadd.xlane.f32.xlu0 %v1771_v17 }
 0x428   : > { %1789 = vadd.xlane.f32.xlu1 %v1772_v53 }
 0x491   : > { %v1816_v32 = vpop.xlane.xlu1 %1815 }
 0x492   : > { %v1833_v11 = vmul.f32 0.0078125, %v1816_v32 }
 0x494   : > { %v3730_v21 = vsub.f32 %v1785_v6, %v1833_v11 }
 0x495   : > { %v1818_v43 = vpop.xlane.xlu0 %1817  ;;  %v1812_v45 = vpop.xlane.xlu1 %1811 }
 0x496   : > { %v1834_v15 = vmul.f32 0.0078125, %v1818_v43  ;;  %v1831_v61 = vmul.f32 0.0078125, %v1812_v45  ;;  %v1865_v9 = vmul.f32 %v3730_v21, %v3730_v21 }
 0x498   : > { %v3736_v55 = vsub.f32 %v1786_v56, %v1834_v15  ;;  %v3740_v18 = vsub.f32 %v1783_v25, %v1831_v61  ;;  %1895 = vadd.xlane.f32.xlu0 %v1865_v9 }
 0x499   : > { %v1808_v24 = vpop.xlane.xlu0 %1807  ;;  %v1814_v3 = vpop.xlane.xlu1 %1813 }
 0x49a   : > { %v1829_v6 = vmul.f32 0.0078125, %v1808_v24  ;;  %v1832_v8 = vmul.f32 0.0078125, %v1814_v3  ;;  %v1866_v44 = vmul.f32 %v3736_v55, %v3736_v55  ;;  %v1863_v1 = vmul.f32 %v3740_v18, %v3740_v18 }
 0x49c   : > { %v3748_v48 = vsub.f32 %v1781_v12, %v1829_v6  ;;  %v3752_v23 = vsub.f32 %v1784_v14, %v1832_v8  ;;  %1897 = vadd.xlane.f32.xlu1 %v1866_v44  ;;  %1891 = vadd.xlane.f32.xlu0 %v1863_v1 }
 0x49d   : > { %v1810_v25 = vpop.xlane.xlu1 %1809  ;;  %v1804_v56 = vpop.xlane.xlu0 %1803 }
 0x49e   : > { %v1830_v29 = vmul.f32 0.0078125, %v1810_v25  ;;  %v1827_v31 = vmul.f32 0.0078125, %v1804_v56  ;;  %v1864_v63 = vmul.f32 %v3752_v23, %v3752_v23  ;;  %v1861_v4 = vmul.f32 %v3748_v48, %v3748_v48 }
 0x4a0   : > { %v3760_v50 = vsub.f32 %v1782_v22, %v1830_v29  ;;  %v3764_v34 = vsub.f32 %v1779_v37, %v1827_v31  ;;  %1893 = vadd.xlane.f32.xlu1 %v1864_v63  ;;  %1887 = vadd.xlane.f32.xlu0 %v1861_v4 }
 0x4a1   : > { %v1806_v12 = vpop.xlane.xlu1 %1805  ;;  %v1800_v14 = vpop.xlane.xlu0 %1799 }
 0x4a2   : > { %v1828_v62 = vmul.f32 0.0078125, %v1806_v12  ;;  %v1825_v38 = vmul.f32 0.0078125, %v1800_v14  ;;  %v1862_v16 = vmul.f32 %v3760_v50, %v3760_v50  ;;  %v1859_v19 = vmul.f32 %v3764_v34, %v3764_v34 }
 0x4a4   : > { %v3772_v54 = vsub.f32 %v1780_v0, %v1828_v62  ;;  %v3776_v5 = vsub.f32 %v1777_v10, %v1825_v38  ;;  %1889 = vadd.xlane.f32.xlu1 %v1862_v16  ;;  %1883 = vadd.xlane.f32.xlu0 %v1859_v19 }
 0x4a5   : > { %v1802_v37 = vpop.xlane.xlu1 %1801  ;;  %v1796_v22 = vpop.xlane.xlu0 %1795 }
 0x4a6   : > { %v1826_v32 = vmul.f32 0.0078125, %v1802_v37  ;;  %v1823_v11 = vmul.f32 0.0078125, %v1796_v22  ;;  %v1860_v43 = vmul.f32 %v3772_v54, %v3772_v54  ;;  %v1857_v45 = vmul.f32 %v3776_v5, %v3776_v5 }
 0x4a8   : > { %v3784_v57 = vsub.f32 %v1778_v51, %v1826_v32  ;;  %v3788_v28 = vsub.f32 %v1775_v47, %v1823_v11  ;;  %1885 = vadd.xlane.f32.xlu1 %v1860_v43  ;;  %1879 = vadd.xlane.f32.xlu0 %v1857_v45  ;;  %v1965_v32 = vsub.s32 4, %v3150_v30 }
 0x4a9   : > { %v1798_v10 = vpop.xlane.xlu1 %1797  ;;  %v1792_v0 = vpop.xlane.xlu0 %1791 }
 0x4aa   : > { %v1824_v15 = vmul.f32 0.0078125, %v1798_v10  ;;  %v1821_v61 = vmul.f32 0.0078125, %v1792_v0  ;;  %v1858_v9 = vmul.f32 %v3784_v57, %v3784_v57  ;;  %v1855_v24 = vmul.f32 %v3788_v28, %v3788_v28 }
 0x4ab   : > { %v3828_v0 = vrot.slane %v3609_v52, %v1965_v32 }
 0x4ac   : > { %v3796_v59 = vsub.f32 %v1776_v40, %v1824_v15  ;;  %v3800_v39 = vsub.f32 %v1773_v33, %v1821_v61  ;;  %1881 = vadd.xlane.f32.xlu1 %v1858_v9  ;;  %1875 = vadd.xlane.f32.xlu0 %v1855_v24  ;;  %v1985_v9 = vsub.s32 5, %v3150_v30 }
 0x4ad   : > { %v1794_v47 = vpop.xlane.xlu1 %1793  ;;  %v1788_v51 = vpop.xlane.xlu0 %1787 }
 0x4ae   : > { %v1822_v3 = vmul.f32 0.0078125, %v1794_v47  ;;  %v1819_v6 = vmul.f32 0.0078125, %v1788_v51  ;;  %v1856_v8 = vmul.f32 %v3796_v59, %v3796_v59  ;;  %v1853_v44 = vmul.f32 %v3800_v39, %v3800_v39 }
 0x4b0   : > { %v3808_v26 = vsub.f32 %v1774_v7, %v1822_v3  ;;  %v3812_v27 = vsub.f32 %v1771_v17, %v1819_v6  ;;  %1877 = vadd.xlane.f32.xlu1 %v1856_v8  ;;  %1871 = vadd.xlane.f32.xlu0 %v1853_v44 }
 0x4b1   : > { %v1790_v33 = vpop.xlane.xlu1 %1789 }
 0x4b2   : > { %v1820_v40 = vmul.f32 0.0078125, %v1790_v33  ;;  %v1854_v1 = vmul.f32 %v3808_v26, %v3808_v26  ;;  %v1851_v25 = vmul.f32 %v3812_v27, %v3812_v27  ;;  %v3834_v33 = vrot.slane %v3609_v52, %v1985_v9 }
 0x4b4   : > { %v3820_v56 = vsub.f32 %v1772_v53, %v1820_v40  ;;  %1873 = vadd.xlane.f32.xlu1 %v1854_v1  ;;  %1867 = vadd.xlane.f32.xlu0 %v1851_v25 }
 0x4b6   : > { %v1852_v13 = vmul.f32 %v3820_v56, %v3820_v56 }
 0x4b8   : > { %1869 = vadd.xlane.f32.xlu1 %v1852_v13 }
 0x4ca   : > { %2030 = vperm.xlu0 %2596, %v3609_v52  }
 0x521   : > { %v1896_v17 = vpop.xlane.xlu0 %1895 }
 0x522   : > { %v1913_v7 = vmul.f32 0.0078125, %v1896_v17 }
 0x524   : > { %v1929_v29 = vadd.f32 1e-05, %v1913_v7 }
 0x525   : > { %v1898_v31 = vpop.xlane.xlu1 %1897  ;;  %v1892_v63 = vpop.xlane.xlu0 %1891 }
 0x526   : > { %2726 = vrsqrt.f32 %v1929_v29  ;;  %v1914_v2 = vmul.f32 0.0078125, %v1898_v31  ;;  %v1911_v53 = vmul.f32 0.0078125, %v1892_v63 }
 0x528   : > { %v1930_v4 = vadd.f32 1e-05, %v1914_v2  ;;  %v1927_v12 = vadd.f32 1e-05, %v1911_v53 }
 0x529   : > { %v1894_v14 = vpop.xlane.xlu1 %1893  ;;  %v1888_v62 = vpop.xlane.xlu0 %1887 }
 0x52a   : > { %2728 = vrsqrt.f32 %v1930_v4  ;;  %v1912_v38 = vmul.f32 0.0078125, %v1894_v14  ;;  %v1909_v16 = vmul.f32 0.0078125, %v1888_v62  ;;  %v4019_v14 = vunpack.i.h.bf16 %v3551_v35 }
 0x52b   : > { %2730 = vrsqrt.f32 %v1927_v12  ;;  %v4018_v12 = vunpack.i.l.bf16 %v3551_v35 }
 0x52c   : > { %v1928_v19 = vadd.f32 1e-05, %v1912_v38  ;;  %v1925_v37 = vadd.f32 1e-05, %v1909_v16 }
 0x52d   : > { %v1890_v22 = vpop.xlane.xlu1 %1889  ;;  %v1884_v43 = vpop.xlane.xlu0 %1883 }
 0x52e   : > { %2732 = vrsqrt.f32 %v1928_v19  ;;  %v1910_v11 = vmul.f32 0.0078125, %v1890_v22  ;;  %v1907_v15 = vmul.f32 0.0078125, %v1884_v43 }
 0x52f   : > { %2734 = vrsqrt.f32 %v1925_v37 }
 0x530   : > { %v1926_v45 = vadd.f32 1e-05, %v1910_v11  ;;  %v1923_v6 = vadd.f32 1e-05, %v1907_v15  ;;  %v4020_v15 = vunpack.i.h.bf16 %v3523_v20 }
 0x531   : > { %v1886_v10 = vpop.xlane.xlu1 %1885  ;;  %v1880_v8 = vpop.xlane.xlu0 %1879 }
 0x532   : > { %2736 = vrsqrt.f32 %v1926_v45  ;;  %v1908_v61 = vmul.f32 0.0078125, %v1886_v10  ;;  %v1905_v17 = vmul.f32 0.0078125, %v1880_v8 }
 0x533   : > { %v2727_v24 = vpop.eup %2726 }
 0x534   : > { %v1924_v47 = vadd.f32 1e-05, %v1908_v61  ;;  %v1961_v51 = vmul.f32 %v2727_v24, %v3730_v21  ;;  %v1921_v4 = vadd.f32 1e-05, %v1905_v17 }
 0x535   : > { %v1882_v3 = vpop.xlane.xlu1 %1881  ;;  %v1876_v19 = vpop.xlane.xlu0 %1875 }
 0x536   : > { %v1981_v44 = vmul.f32 %v3828_v0, %v1961_v51  ;;  %2738 = vrsqrt.f32 %v1924_v47  ;;  %v1906_v25 = vmul.f32 0.0078125, %v1882_v3  ;;  %v1903_v11 = vmul.f32 0.0078125, %v1876_v19 }
 0x537   : > { %v2729_v40 = vpop.eup %2728  ;;  %2740 = vrsqrt.f32 %v1923_v6  ;;  %v4021_v47 = vunpack.i.l.bf16 %v3523_v20  ;;  %v4024_v19 = vunpack.i.h.bf16 %v3480_v41 }
 0x538   : > { %v2731_v1 = vpop.eup %2730  ;;  %v1962_v13 = vmul.f32 %v2729_v40, %v3736_v55  ;;  %v2001_v21 = vadd.f32 %v3834_v33, %v1981_v44  ;;  %v1922_v31 = vadd.f32 1e-05, %v1906_v25 }
 0x539   : > { %v1959_v7 = vmul.f32 %v2731_v1, %v3740_v18  ;;  %v1878_v2 = vpop.xlane.xlu1 %1877  ;;  %v1872_v8 = vpop.xlane.xlu0 %1871 }
 0x53a   : > { %v1982_v30 = vmul.f32 %v3828_v0, %v1962_v13  ;;  %v2017_v55 = vmul.f32 %v4018_v12, %v2001_v21  ;;  %2742 = vrsqrt.f32 %v1922_v31  ;;  %v1904_v37 = vmul.f32 0.0078125, %v1878_v2 }
 0x53b   : > { %v2733_v29 = vpop.eup %2732  ;;  %v1979_v38 = vmul.f32 %v3828_v0, %v1959_v7  ;;  %2744 = vrsqrt.f32 %v1921_v4  ;;  %v1901_v25 = vmul.f32 0.0078125, %v1872_v8 }
 0x53c   : > { %v2002_v63 = vadd.f32 %v3834_v33, %v1982_v30  ;;  %v1960_v52 = vmul.f32 %v2733_v29, %v3752_v23  ;;  %v2735_v53 = vpop.eup %2734  ;;  %v1920_v45 = vadd.f32 1e-05, %v1904_v37  ;;  %v4022_v30 = vunpack.i.h.bf16 %v3509_v46 }
 0x53d   : > { %v1999_v43 = vadd.f32 %v3834_v33, %v1979_v38  ;;  %v1957_v35 = vmul.f32 %v2735_v53, %v3748_v48  ;;  %v1874_v10 = vpop.xlane.xlu1 %1873  ;;  %v1868_v4 = vpop.xlane.xlu0 %1867 }
 0x53e   : > { %v2018_v62 = vmul.f32 %v4019_v14, %v2002_v63  ;;  %v1980_v18 = vmul.f32 %v3828_v0, %v1960_v52  ;;  %v1902_v44 = vmul.f32 0.0078125, %v1874_v10  ;;  %2746 = vrsqrt.f32 %v1920_v45 }
 0x53f   : > { %v2737_v16 = vpop.eup %2736  ;;  %v2015_v51 = vmul.f32 %v4021_v47, %v1999_v43  ;;  %v1977_v3 = vmul.f32 %v3828_v0, %v1957_v35  ;;  %v1917_v63 = vadd.f32 1e-05, %v1901_v25  ;;  %v4029_v25 = vunpack.i.l.bf16 %v3320_v60 }
 0x540   : > { %v2026_v22 = vpack.c.bf16 %v2018_v62, %v2017_v55  ;;  %v1958_v23 = vmul.f32 %v2737_v16, %v3760_v50  ;;  %v2000_v32 = vadd.f32 %v3834_v33, %v1980_v18  ;;  %v1919_v50 = vadd.f32 1e-05, %v1903_v11 }
 0x541   : > { %v1997_v13 = vadd.f32 %v3834_v33, %v1977_v3  ;;  %v1918_v20 = vadd.f32 1e-05, %v1902_v44  ;;  %v1870_v31 = vpop.xlane.xlu1 %1869  ;;  %v1899_v62 = vmul.f32 0.0078125, %v1868_v4 }
 0x542   : > { %2505 = vmatpush3.bf16.xpose.msra.mxu1 %v2026_v22  ;;  %v2016_v61 = vmul.f32 %v4020_v15, %v2000_v32  ;;  %v1978_v9 = vmul.f32 %v3828_v0, %v1958_v23  ;;  %2748 = vrsqrt.f32 %v1919_v50  ;;  %v4025_v32 = vunpack.i.l.bf16 %v3480_v41 }
 0x543   : > { %2506 = vmatprep.subr.bf16.mxu1 %v4017_v36  ;;  %v2739_v24 = vpop.eup %2738  ;;  %2750 = vrsqrt.f32 %v1918_v20  ;;  %v1915_v23 = vadd.f32 1e-05, %v1899_v62  ;;  %v4026_v41 = vunpack.i.h.bf16 %v3482_v42  ;;  %v4027_v50 = vunpack.i.l.bf16 %v3482_v42 }
 0x544   : > { %v2741_v6 = vpop.eup %2740  ;;  %v2025_v48 = vpack.c.bf16 %v2016_v61, %v2015_v51  ;;  %v1998_v40 = vadd.f32 %v3834_v33, %v1978_v9  ;;  %v1956_v1 = vmul.f32 %v2739_v24, %v3772_v54  ;;  %v4023_v54 = vunpack.i.l.bf16 %v3509_v46 }
 0x545   : > { %v1955_v17 = vmul.f32 %v2741_v6, %v3764_v34  ;;  %v1900_v34 = vmul.f32 0.0078125, %v1870_v31  ;;  %2752 = vrsqrt.f32 %v1917_v63  ;;  %v4031_v63 = vunpack.i.l.bf16 %v3316_v49 }
 0x546   : > { %v2014_v21 = vmul.f32 %v4022_v30, %v1998_v40  ;;  %v1976_v7 = vmul.f32 %v3828_v0, %v1956_v1  ;;  %v2013_v52 = vmul.f32 %v4023_v54, %v1997_v13 }
 0x547   : > { %v2743_v29 = vpop.eup %2742  ;;  %v1975_v2 = vmul.f32 %v3828_v0, %v1955_v17  ;;  %v1916_v46 = vadd.f32 1e-05, %v1900_v34  ;;  %v4033_v34 = vunpack.i.l.bf16 %v3318_v58 }
 0x548   : > { %v2745_v53 = vpop.eup %2744  ;;  %v2024_v12 = vpack.c.bf16 %v2014_v21, %v2013_v52  ;;  %v1996_v55 = vadd.f32 %v3834_v33, %v1976_v7  ;;  %v1954_v14 = vmul.f32 %v2743_v29, %v3784_v57  ;;  %v4030_v29 = vunpack.i.h.bf16 %v3316_v49  ;;  %v2027_v49 = vld [vmem:[%s3976_s4] sm:$0x1] }
 0x549   : > { %v1995_v38 = vadd.f32 %v3834_v33, %v1975_v2  ;;  %v1953_v16 = vmul.f32 %v2745_v53, %v3776_v5  ;;  %2754 = vrsqrt.f32 %v1916_v46  ;;  %v4032_v53 = vunpack.i.h.bf16 %v3318_v58 }
 0x54a   : > { %2507 = vmatpush3.bf16.xpose.msra.mxu1 %v2025_v48  ;;  %v2012_v18 = vmul.f32 %v4024_v19, %v1996_v55  ;;  %v1974_v37 = vmul.f32 %v3828_v0, %v1954_v14  ;;  %2756 = vrsqrt.f32 %v1915_v23  ;;  %v4028_v48 = vunpack.i.h.bf16 %v3320_v60 }
 0x54b   : > { %2508 = vmatprep.subr.bf16.mxu1 %v4017_v36  ;;  %v2747_v22 = vpop.eup %2746  ;;  %v2011_v57 = vmul.f32 %v4025_v32, %v1995_v38  ;;  %v1973_v11 = vmul.f32 %v3828_v0, %v1953_v16 }
 0x54c   : > { %v1994_v5 = vadd.f32 %v3834_v33, %v1974_v37  ;;  %v1952_v45 = vmul.f32 %v2747_v22, %v3796_v59 }
 0x54d   : > { %v2023_v35 = vpack.c.bf16 %v2012_v18, %v2011_v57  ;;  %v1993_v10 = vadd.f32 %v3834_v33, %v1973_v11 }
 0x54e   : > { %v2010_v9 = vmul.f32 %v4026_v41, %v1994_v5  ;;  %v1972_v24 = vmul.f32 %v3828_v0, %v1952_v45 }
 0x54f   : > { %v2749_v43 = vpop.eup %2748  ;;  %v2009_v47 = vmul.f32 %v4027_v50, %v1993_v10 }
 0x550   : > { %v1951_v15 = vmul.f32 %v2749_v43, %v3788_v28  ;;  %v2751_v61 = vpop.eup %2750  ;;  %v1992_v6 = vadd.f32 %v3834_v33, %v1972_v24 }
 0x551   : > { %v2022_v3 = vpack.c.bf16 %v2010_v9, %v2009_v47  ;;  %v1950_v8 = vmul.f32 %v2751_v61, %v3808_v26 }
 0x552   : > { %2509 = vmatpush3.bf16.xpose.msra.mxu1 %v2024_v12  ;;  %v1971_v51 = vmul.f32 %v3828_v0, %v1951_v15  ;;  %v2753_v59 = vpop.eup %2752  ;;  %v2008_v40 = vmul.f32 %v4028_v48, %v1992_v6 }
 0x553   : > { %2510 = vmatprep.subr.bf16.mxu1 %v4017_v36  ;;  %v1949_v44 = vmul.f32 %v2753_v59, %v3800_v39  ;;  %v1970_v42 = vmul.f32 %v3828_v0, %v1950_v8 }
 0x554   : > { %v1991_v28 = vadd.f32 %v3834_v33, %v1971_v51 }
 0x555   : > { %v1969_v17 = vmul.f32 %v3828_v0, %v1949_v44  ;;  %v1990_v21 = vadd.f32 %v3834_v33, %v1970_v42 }
 0x556   : > { %v2755_v1 = vpop.eup %2754  ;;  %v2007_v13 = vmul.f32 %v4029_v25, %v1991_v28 }
 0x557   : > { %v2757_v20 = vpop.eup %2756  ;;  %v1948_v26 = vmul.f32 %v2755_v1, %v3820_v56  ;;  %v1989_v39 = vadd.f32 %v3834_v33, %v1969_v17  ;;  %v2006_v31 = vmul.f32 %v4030_v29, %v1990_v21 }
 0x558   : > { %v2021_v30 = vpack.c.bf16 %v2008_v40, %v2007_v13  ;;  %v1947_v7 = vmul.f32 %v2757_v20, %v3812_v27 }
 0x559   : > { %v1968_v60 = vmul.f32 %v3828_v0, %v1948_v26  ;;  %v2005_v56 = vmul.f32 %v4031_v63, %v1989_v39 }
 0x55a   : > { %2511 = vmatpush3.bf16.xpose.msra.mxu1 %v2023_v35  ;;  %v1967_v54 = vmul.f32 %v3828_v0, %v1947_v7  ;;  %v2031_v0 = vpop.permute.xlu0 %2030 }
 0x55b   : > { %2512 = vmatprep.subr.bf16.mxu1 %v4017_v36  ;;  %v2020_v52 = vpack.c.bf16 %v2006_v31, %v2005_v56  ;;  %v1988_v2 = vadd.f32 %v3834_v33, %v1968_v60 }
 0x55c   : > { %v1987_v27 = vadd.f32 %v3834_v33, %v1967_v54 }
 0x55d   : > { %v2004_v4 = vmul.f32 %v4032_v53, %v1988_v2 }
 0x55e   : > { %v2003_v12 = vmul.f32 %v4033_v34, %v1987_v27 }
 0x560   : > { %v2019_v55 = vpack.c.bf16 %v2004_v4, %v2003_v12 }
 0x562   : > { %2513 = vmatpush3.bf16.xpose.msra.mxu1 %v2022_v3 }
 0x563   : > { %2514 = vmatprep.subr.bf16.mxu1 %v4017_v36 }
 0x56a   : > { %2515 = vmatpush3.bf16.xpose.msra.mxu1 %v2021_v30 }
 0x56b   : > { %2516 = vmatprep.subr.bf16.mxu1 %v4017_v36 }
 0x572   : > { %2517 = vmatpush3.bf16.xpose.msra.mxu1 %v2020_v52 }
 0x573   : > { %2518 = vmatprep.subr.bf16.mxu1 %v4017_v36  ;;  %v2032_v36 = vrot.slane %v2031_v0, 6 }
 0x57a   : > { %2519 = vmatpush3.bf16.xpose.msra.mxu1 %v2019_v55 }
 0x581   : > { %2521 = vmatmul.mubr.bf16.vlgmr.msra.gmra.mxu1 %v2027_v49 }
 0x641   : > { %v2068_v33 = vpop.f32.mrf.mxu1 }
 0x642   : > { %v2069_v14 = vadd.f32 %v2068_v33, %v2032_v36 }
 0x643   : > { %v2522_v58 = vpop.f32.mrf.mxu1 }
 0x644   : > { %2074 = vst [vmem:[%s308_s13] sm:$0x1] %v2069_v14 }
 0x645   : > { %v2071_v62 = vpop.f32.mrf.mxu1 }
 0x646   : > { %2852 = shalt.err (!%p2849_p11)
}
 0x647   : > { %s2853_s16 = scalar_lea.hbm %s3929_s29, 16  ;;  %s2857_s10 = scalar_lea.hbm %s3978_s6, 32 }
 0x648   : > { %p2854_p9 = scmp.ne.s32.totalorder %s3929_s29, %s2853_s16  ;;  %p2858_p6 = scmp.lt.s32.totalorder %s3929_s29, %s3978_s6 }
 0x649   : > { %p2859_p8 = scmp.lt.s32.totalorder %s2857_s10, %s2853_s16 }
 0x64a   : > { %p2855_p1 = pnand %p2854_p9, %p4034_p7 }
 0x64b   : > { %p2860_p5 = por %p2859_p8, %p2858_p6 }
 0x64c   : > { %p2856_p4 = pneg %p2855_p1 }
 0x64e   : > { %p2861_p2 = pnand %p2860_p5, %p2856_p4 }
 0x650   : > { %2864 = shalt.err (!%p2861_p2)
}
 0x651   : > { %2534 = dma.vmem_to_hbm [thread:$0]  (%p4034_p7), %s3931_s9, 16, %s3929_s29, %s2076_s15   ;;  %v2523_v38 = vpop.f32.mrf.mxu1 }
 0x652 PF: > { %s2100_s13 = sand.u32 1, %s2895_s21   ;;  %p4035_p12 = scmp.ne.s32.totalorder %s4004_s28, 0 }
 0x653   : > { %p4036_p13 = scmp.ge.s32.totalorder %s2907_s24, 2  ;;  %s2101_s14 = scalar_lea.sflag [#allocation4], %s2100_s13 }
 0x655   : > { %p2548_p0 = pnand %p4036_p13, %p4035_p12 }
 0x657   : > { %p2549_p10 = pneg %p2548_p0 }
 0x659   : > { %2890 = dma.done.wait (%p2549_p10), %s2101_s14, 16  }
 0x65a   : > { %2892 = vsyncadd (%p2549_p10), %s2101_s14, 4294967280  ;;  %p20_p3 = scmp.ge.s32.totalorder %s3031_s19, 4   ;;  %s4037_s21 = smov %s2899_s22 }
 0x65b   : > { %s4038_s22 = smov %s2903_s23  ;;  %s4039_s23 = smov %s3047_s7 }
 0x65c   : > { %s4040_s24 = smov %s3031_s19  ;;  %22 = sbr.rel (!%p20_p3) target bundleno = 6 (0x6), region = 100 }
 0x661   :  { %2105 = vsyncpa [#allocation3], 1 }
 0x662   :  { %2107 = vsyncpa [#allocation3 + $0x1], 1 }
 0x663   :  { %2108 = vsyncpa [#allocation6], 1 }
 0x664   :  { %2109 = vsyncpa [#allocation4], 1 }
 0x665   :  { %2111 = vsyncpa [#allocation4 + $0x1], 1 }

</bundles_post_ra>
